<compile_context>
chip_gen: v6e
topology: v6e:2x2x1
jax: 0.10.0
libtpu: 0.0.40
codegen_flags: <defaults>
</compile_context>

<pallas_src>
import math

import jax
import jax.numpy as jnp
from jax.experimental import pallas as pl
from jax.experimental.pallas import tpu as pltpu

# ----------------------- tiny-BERT config (small shapes) -----------------------
B = 2          # batch
L = 8          # sequence length
H = 32         # hidden size
NH = 2         # attention heads
DH = H // NH   # head dim
F = 64         # FFN intermediate
VOCAB = 128
NLAYERS = 2
LN_EPS = 1e-12


# ------------------------- single fused encoder kernel -------------------------
def _encoder_kernel(x_ref, mbias_ref, emb_g_ref, emb_b_ref,
                    wqkv_ref, bqkv_ref, wo_ref, bo_ref,
                    ln1_g_ref, ln1_b_ref,
                    w1_ref, fb1_ref, w2_ref, fb2_ref,
                    ln2_g_ref, ln2_b_ref,
                    pool_w_ref, pool_b_ref,
                    out_ref):
    """Processes ONE sequence (grid axis = batch).  Everything stays in VMEM.

    x_ref      : [L, H]   f32  summed embeddings for this sequence
    mbias_ref  : [1, L]   f32  additive key-axis mask bias ((1-att) * -1e9)
    w*_ref     : stacked per-layer weights (bf16 matrices, f32 biases / LN params)
    out_ref    : [1, H]   f32  pooler output for this sequence
    """
    scale = 1.0 / math.sqrt(DH)

    def layernorm(v, g, b):
        mu = jnp.mean(v, axis=-1, keepdims=True)
        var = jnp.mean((v - mu) ** 2, axis=-1, keepdims=True)
        return (v - mu) * jax.lax.rsqrt(var + LN_EPS) * g + b

    # --- embedding LayerNorm (no zeros residual needed) ---
    x = layernorm(x_ref[...], emb_g_ref[...], emb_b_ref[...])        # [L, H] f32
    mbias = mbias_ref[...]                                           # [1, L]

    # --- transformer layers (static Python loop; traced once) ---
    for l in range(NLAYERS):
        # fused QKV projection: [L, H] @ [H, 3H]
        qkv = (jnp.dot(x.astype(jnp.bfloat16), wqkv_ref[l],
                       preferred_element_type=jnp.float32)
               + bqkv_ref[l])                                        # [L, 3H] f32

        # per-head attention via contiguous lane slices of qkv
        ctx_heads = []
        for h in range(NH):
            qh = qkv[:, h * DH:(h + 1) * DH].astype(jnp.bfloat16)          # [L, DH]
            kh = qkv[:, H + h * DH:H + (h + 1) * DH].astype(jnp.bfloat16)  # [L, DH]
            vh = qkv[:, 2 * H + h * DH:2 * H + (h + 1) * DH].astype(jnp.bfloat16)

            # scores = q @ k^T  (contract on the head dim, no explicit transpose)
            s = jax.lax.dot_general(
                qh, kh, (((1,), (1,)), ((), ())),
                preferred_element_type=jnp.float32) * scale           # [L, L] f32
            s = s + mbias                                             # mask keys
            s = s - jnp.max(s, axis=-1, keepdims=True)
            p = jnp.exp(s)
            p = p * pl.reciprocal(jnp.sum(p, axis=-1, keepdims=True), approx=True)

            ctx_heads.append(
                jnp.dot(p.astype(jnp.bfloat16), vh,
                        preferred_element_type=jnp.float32))          # [L, DH] f32

        ctx = jnp.concatenate(ctx_heads, axis=-1)                     # [L, H] f32
        attn_out = (jnp.dot(ctx.astype(jnp.bfloat16), wo_ref[l],
                            preferred_element_type=jnp.float32)
                    + bo_ref[l])                                      # [L, H]
        x = layernorm(attn_out + x, ln1_g_ref[l], ln1_b_ref[l])

        # feed-forward
        ffn = (jnp.dot(x.astype(jnp.bfloat16), w1_ref[l],
                       preferred_element_type=jnp.float32) + fb1_ref[l])
        # TODO(synk): exact erf GELU (jax.nn.gelu(..., approximate=False)) for
        #             bit-parity with HF BERT; tanh approximation kept here.
        ffn = jax.nn.gelu(ffn)
        ffn = (jnp.dot(ffn.astype(jnp.bfloat16), w2_ref[l],
                       preferred_element_type=jnp.float32) + fb2_ref[l])
        x = layernorm(ffn + x, ln2_g_ref[l], ln2_b_ref[l])

    # --- pooler: tanh(W @ h_CLS + b) on the first (CLS) row ---
    cls = x[0:1, :]                                                   # [1, H]
    pooled = jnp.tanh(jnp.dot(cls.astype(jnp.bfloat16), pool_w_ref[...],
                              preferred_element_type=jnp.float32)
                      + pool_b_ref[...])
    out_ref[...] = pooled


# ------------------------------ parameter init ---------------------------------
def init_params(key):
    def nrm(k, shape, scale=0.02):
        return scale * jax.random.normal(k, shape, jnp.float32)

    keys = iter(jax.random.split(key, 64))
    p = {
        "word_emb": nrm(next(keys), (VOCAB, H)),
        "pos_emb": nrm(next(keys), (L, H)),
        "type_emb": nrm(next(keys), (2, H)),
        "emb_ln_g": jnp.ones((H,), jnp.float32),
        "emb_ln_b": jnp.zeros((H,), jnp.float32),
        "pooler_w": nrm(next(keys), (H, H)),
        "pooler_b": jnp.zeros((H,), jnp.float32),
        "layers": [],
    }
    for _ in range(NLAYERS):
        lyr = {
            "wq": nrm(next(keys), (H, H)), "bq": jnp.zeros((H,), jnp.float32),
            "wk": nrm(next(keys), (H, H)), "bk": jnp.zeros((H,), jnp.float32),
            "wv": nrm(next(keys), (H, H)), "bv": jnp.zeros((H,), jnp.float32),
            "wo": nrm(next(keys), (H, H)), "bo": jnp.zeros((H,), jnp.float32),
            "ln1_g": jnp.ones((H,), jnp.float32), "ln1_b": jnp.zeros((H,), jnp.float32),
            "w1": nrm(next(keys), (H, F)), "b1": jnp.zeros((F,), jnp.float32),
            "w2": nrm(next(keys), (F, H)), "b2": jnp.zeros((H,), jnp.float32),
            "ln2_g": jnp.ones((H,), jnp.float32), "ln2_b": jnp.zeros((H,), jnp.float32),
        }
        p["layers"].append(lyr)
    return p


def pack_params(p):
    """Stack per-layer weights on a leading [NLAYERS] axis; matmul weights -> bf16."""
    ls = p["layers"]

    def stack2d(key):                      # [NL, 1, dim] (biases / LN params, f32)
        return jnp.stack([l[key][None, :] for l in ls])

    packed = {
        "word_emb": p["word_emb"],
        "pos_emb": p["pos_emb"],
        "type_emb": p["type_emb"],
        "emb_ln_g": p["emb_ln_g"][None, :],
        "emb_ln_b": p["emb_ln_b"][None, :],
        "wqkv": jnp.stack([jnp.concatenate([l["wq"], l["wk"], l["wv"]], axis=1)
                           for l in ls]).astype(jnp.bfloat16),        # [NL, H, 3H]
        "bqkv": jnp.stack([jnp.concatenate([l["bq"], l["bk"], l["bv"]])[None, :]
                           for l in ls]),                             # [NL, 1, 3H]
        "wo": jnp.stack([l["wo"] for l in ls]).astype(jnp.bfloat16),
        "bo": stack2d("bo"),
        "ln1_g": stack2d("ln1_g"), "ln1_b": stack2d("ln1_b"),
        "w1": jnp.stack([l["w1"] for l in ls]).astype(jnp.bfloat16),
        "b1": stack2d("b1"),
        "w2": jnp.stack([l["w2"] for l in ls]).astype(jnp.bfloat16),
        "b2": stack2d("b2"),
        "ln2_g": stack2d("ln2_g"), "ln2_b": stack2d("ln2_b"),
        "pooler_w": p["pooler_w"].astype(jnp.bfloat16),
        "pooler_b": p["pooler_b"][None, :],
    }
    return packed


# ------------------------------ model forward ----------------------------------
@jax.jit
def big_model_forward(pp, tok, att):
    """Equivalent of BigModel.forward(tok, att): pooler_output -> Dropout(eval)."""
    # --- embeddings (gather is glue; everything else runs in the fused kernel) ---
    typ = jnp.zeros_like(tok)                           # token_type_ids = zeros
    emb = (jnp.take(pp["word_emb"], tok, axis=0)
           + jnp.take(pp["type_emb"], typ, axis=0)
           + pp["pos_emb"][None, :, :])                 # [B, L, H]
    emb2d = emb.reshape(B * L, H)

    # additive key-axis mask bias, precomputed once: [B, 1, L]
    mbias = ((1.0 - att.astype(jnp.float32)) * (-1e9))[:, None, :]

    nl = NLAYERS
    pooled = pl.pallas_call(
        _encoder_kernel,
        out_shape=jax.ShapeDtypeStruct((B, 1, H), jnp.float32),
        grid=(B,),
        in_specs=[
            pl.BlockSpec((L, H), lambda b: (b, 0)),                 # emb rows of this seq
            pl.BlockSpec((None, 1, L), lambda b: (b, 0, 0)),        # mask bias of this seq
            pl.BlockSpec((1, H), lambda b: (0, 0)),                 # emb_ln_g
            pl.BlockSpec((1, H), lambda b: (0, 0)),                 # emb_ln_b
            pl.BlockSpec((nl, H, 3 * H), lambda b: (0, 0, 0)),      # wqkv (bf16)
            pl.BlockSpec((nl, 1, 3 * H), lambda b: (0, 0, 0)),      # bqkv
            pl.BlockSpec((nl, H, H), lambda b: (0, 0, 0)),          # wo (bf16)
            pl.BlockSpec((nl, 1, H), lambda b: (0, 0, 0)),          # bo
            pl.BlockSpec((nl, 1, H), lambda b: (0, 0, 0)),          # ln1_g
            pl.BlockSpec((nl, 1, H), lambda b: (0, 0, 0)),          # ln1_b
            pl.BlockSpec((nl, H, F), lambda b: (0, 0, 0)),          # w1 (bf16)
            pl.BlockSpec((nl, 1, F), lambda b: (0, 0, 0)),          # b1
            pl.BlockSpec((nl, F, H), lambda b: (0, 0, 0)),          # w2 (bf16)
            pl.BlockSpec((nl, 1, H), lambda b: (0, 0, 0)),          # b2
            pl.BlockSpec((nl, 1, H), lambda b: (0, 0, 0)),          # ln2_g
            pl.BlockSpec((nl, 1, H), lambda b: (0, 0, 0)),          # ln2_b
            pl.BlockSpec((H, H), lambda b: (0, 0)),                 # pooler_w (bf16)
            pl.BlockSpec((1, H), lambda b: (0, 0)),                 # pooler_b
        ],
        out_specs=pl.BlockSpec((None, 1, H), lambda b: (b, 0, 0)),
        compiler_params=pltpu.CompilerParams(
            dimension_semantics=("parallel",)),                     # batch across TCs (v7x)
    )(emb2d, mbias,
      pp["emb_ln_g"], pp["emb_ln_b"],
      pp["wqkv"], pp["bqkv"], pp["wo"], pp["bo"],
      pp["ln1_g"], pp["ln1_b"],
      pp["w1"], pp["b1"], pp["w2"], pp["b2"],
      pp["ln2_g"], pp["ln2_b"],
      pp["pooler_w"], pp["pooler_b"])

    # nn.Dropout(0.1) in eval mode is identity.
    # TODO(synk): training-mode dropout would use pltpu.prng_seed + stateful_bernoulli.
    return pooled.reshape(B, H)


# ----------------------------------- main ---------------------------------------
if __name__ == "__main__":
    key = jax.random.PRNGKey(0)
    k_param, k_tok = jax.random.split(key)

    params = init_params(k_param)
    packed = pack_params(params)

    tok = jax.random.randint(k_tok, (B, L), 0, VOCAB, dtype=jnp.int32)
    # attention mask: first sequence fully valid, second has 2 padded positions
    att = jnp.array([[1, 1, 1, 1, 1, 1, 1, 1],
                     [1, 1, 1, 1, 1, 1, 0, 0]], dtype=jnp.int32)

    logits = big_model_forward(packed, tok, att)
    logits = jax.block_until_ready(logits)

    assert logits.shape == (B, H), logits.shape
    assert bool(jnp.all(jnp.isfinite(logits)))
    print("KERNEL_OK")
</pallas_src>

<mosaic_0001>
module attributes {stable_mosaic.version = 11 : i64} {
  func.func @_encoder_kernel(%arg0: i32, %arg1: memref<8x32xf32, #tpu.memory_space<vmem>>, %arg2: memref<1x1x8xf32, #tpu.memory_space<vmem>>, %arg3: memref<1x32xf32, #tpu.memory_space<vmem>>, %arg4: memref<1x32xf32, #tpu.memory_space<vmem>>, %arg5: memref<2x32x96xbf16, #tpu.memory_space<vmem>>, %arg6: memref<2x1x96xf32, #tpu.memory_space<vmem>>, %arg7: memref<2x32x32xbf16, #tpu.memory_space<vmem>>, %arg8: memref<2x1x32xf32, #tpu.memory_space<vmem>>, %arg9: memref<2x1x32xf32, #tpu.memory_space<vmem>>, %arg10: memref<2x1x32xf32, #tpu.memory_space<vmem>>, %arg11: memref<2x32x64xbf16, #tpu.memory_space<vmem>>, %arg12: memref<2x1x64xf32, #tpu.memory_space<vmem>>, %arg13: memref<2x64x32xbf16, #tpu.memory_space<vmem>>, %arg14: memref<2x1x32xf32, #tpu.memory_space<vmem>>, %arg15: memref<2x1x32xf32, #tpu.memory_space<vmem>>, %arg16: memref<2x1x32xf32, #tpu.memory_space<vmem>>, %arg17: memref<32x32xbf16, #tpu.memory_space<vmem>>, %arg18: memref<1x32xf32, #tpu.memory_space<vmem>>, %arg19: memref<1x1x32xf32, #tpu.memory_space<vmem>>) attributes {dimension_semantics = [#tpu.dimension_semantics<parallel>], iteration_bounds = array<i64: 2>, scalar_prefetch = 0 : i64, scratch_operands = 0 : i64, tpu.core_type = #tpu.core_type<tc>, window_params = [{transform_indices = @transform_0, window_bounds = array<i64: 8, 32>}, {transform_indices = @transform_1, window_bounds = array<i64: 1, 1, 8>}, {pipeline_mode = #tpu.pipeline_mode<synchronous>, transform_indices = @transform_2, window_bounds = array<i64: 1, 32>}, {pipeline_mode = #tpu.pipeline_mode<synchronous>, transform_indices = @transform_3, window_bounds = array<i64: 1, 32>}, {pipeline_mode = #tpu.pipeline_mode<synchronous>, transform_indices = @transform_4, window_bounds = array<i64: 2, 32, 96>}, {pipeline_mode = #tpu.pipeline_mode<synchronous>, transform_indices = @transform_5, window_bounds = array<i64: 2, 1, 96>}, {pipeline_mode = #tpu.pipeline_mode<synchronous>, transform_indices = @transform_6, window_bounds = array<i64: 2, 32, 32>}, {pipeline_mode = #tpu.pipeline_mode<synchronous>, transform_indices = @transform_7, window_bounds = array<i64: 2, 1, 32>}, {pipeline_mode = #tpu.pipeline_mode<synchronous>, transform_indices = @transform_8, window_bounds = array<i64: 2, 1, 32>}, {pipeline_mode = #tpu.pipeline_mode<synchronous>, transform_indices = @transform_9, window_bounds = array<i64: 2, 1, 32>}, {pipeline_mode = #tpu.pipeline_mode<synchronous>, transform_indices = @transform_10, window_bounds = array<i64: 2, 32, 64>}, {pipeline_mode = #tpu.pipeline_mode<synchronous>, transform_indices = @transform_11, window_bounds = array<i64: 2, 1, 64>}, {pipeline_mode = #tpu.pipeline_mode<synchronous>, transform_indices = @transform_12, window_bounds = array<i64: 2, 64, 32>}, {pipeline_mode = #tpu.pipeline_mode<synchronous>, transform_indices = @transform_13, window_bounds = array<i64: 2, 1, 32>}, {pipeline_mode = #tpu.pipeline_mode<synchronous>, transform_indices = @transform_14, window_bounds = array<i64: 2, 1, 32>}, {pipeline_mode = #tpu.pipeline_mode<synchronous>, transform_indices = @transform_15, window_bounds = array<i64: 2, 1, 32>}, {pipeline_mode = #tpu.pipeline_mode<synchronous>, transform_indices = @transform_16, window_bounds = array<i64: 32, 32>}, {pipeline_mode = #tpu.pipeline_mode<synchronous>, transform_indices = @transform_17, window_bounds = array<i64: 1, 32>}, {transform_indices = @transform_18, window_bounds = array<i64: 1, 1, 32>}]} {
    %c0 = arith.constant 0 : index
    %c0_0 = arith.constant 0 : index
    %0 = vector.load %arg1[%c0, %c0_0] : memref<8x32xf32, #tpu.memory_space<vmem>>, vector<8x32xf32>
    %c0_1 = arith.constant 0 : index
    %c0_2 = arith.constant 0 : index
    %1 = vector.load %arg3[%c0_1, %c0_2] : memref<1x32xf32, #tpu.memory_space<vmem>>, vector<1x32xf32>
    %c0_3 = arith.constant 0 : index
    %c0_4 = arith.constant 0 : index
    %2 = vector.load %arg4[%c0_3, %c0_4] : memref<1x32xf32, #tpu.memory_space<vmem>>, vector<1x32xf32>
    %cst = arith.constant dense<0.000000e+00> : vector<8xf32>
    %3 = vector.multi_reduction <add>, %0, %cst [1] : vector<8x32xf32> to vector<8xf32>
    %4 = vector.shape_cast %3 : vector<8xf32> to vector<8x1xf32>
    %cst_5 = arith.constant 3.200000e+01 : f32
    %5 = vector.broadcast %cst_5 : f32 to vector<8x1xf32>
    %6 = arith.divf %4, %5 : vector<8x1xf32>
    %7 = vector.broadcast %6 : vector<8x1xf32> to vector<8x32xf32>
    %8 = arith.subf %0, %7 : vector<8x32xf32>
    %9 = arith.mulf %8, %8 : vector<8x32xf32>
    %cst_6 = arith.constant dense<0.000000e+00> : vector<8xf32>
    %10 = vector.multi_reduction <add>, %9, %cst_6 [1] : vector<8x32xf32> to vector<8xf32>
    %11 = vector.shape_cast %10 : vector<8xf32> to vector<8x1xf32>
    %cst_7 = arith.constant 3.200000e+01 : f32
    %12 = vector.broadcast %cst_7 : f32 to vector<8x1xf32>
    %13 = arith.divf %11, %12 : vector<8x1xf32>
    %14 = vector.broadcast %6 : vector<8x1xf32> to vector<8x32xf32>
    %15 = arith.subf %0, %14 : vector<8x32xf32>
    %cst_8 = arith.constant 9.99999996E-13 : f32
    %16 = vector.broadcast %cst_8 : f32 to vector<8x1xf32>
    %17 = arith.addf %13, %16 : vector<8x1xf32>
    %18 = math.rsqrt %17 : vector<8x1xf32>
    %19 = vector.broadcast %18 : vector<8x1xf32> to vector<8x32xf32>
    %20 = arith.mulf %15, %19 : vector<8x32xf32>
    %21 = vector.broadcast %1 : vector<1x32xf32> to vector<8x32xf32>
    %22 = arith.mulf %20, %21 : vector<8x32xf32>
    %23 = vector.broadcast %2 : vector<1x32xf32> to vector<8x32xf32>
    %24 = arith.addf %22, %23 : vector<8x32xf32>
    %c0_9 = arith.constant 0 : index
    %c0_10 = arith.constant 0 : index
    %c0_11 = arith.constant 0 : index
    %25 = vector.load %arg2[%c0_9, %c0_10, %c0_11] : memref<1x1x8xf32, #tpu.memory_space<vmem>>, vector<1x1x8xf32>
    %26 = vector.shape_cast %25 : vector<1x1x8xf32> to vector<1x8xf32>
    %27 = arith.truncf %24 : vector<8x32xf32> to vector<8x32xbf16>
    %c0_12 = arith.constant 0 : index
    %c0_13 = arith.constant 0 : index
    %c0_14 = arith.constant 0 : index
    %28 = vector.load %arg5[%c0_12, %c0_13, %c0_14] : memref<2x32x96xbf16, #tpu.memory_space<vmem>>, vector<1x32x96xbf16>
    %29 = vector.shape_cast %28 : vector<1x32x96xbf16> to vector<32x96xbf16>
    %cst_15 = arith.constant dense<0.000000e+00> : vector<8x96xf32>
    %30 = tpu.matmul %27, %29, %cst_15 {dimension_numbers = #tpu.dot_dimension_numbers<[1], [0], [0], [1], [0, 0, 1, 1], [], []>} : vector<8x32xbf16>, vector<32x96xbf16>, vector<8x96xf32> -> vector<8x96xf32>
    %c0_16 = arith.constant 0 : index
    %c0_17 = arith.constant 0 : index
    %c0_18 = arith.constant 0 : index
    %31 = vector.load %arg6[%c0_16, %c0_17, %c0_18] : memref<2x1x96xf32, #tpu.memory_space<vmem>>, vector<1x1x96xf32>
    %32 = vector.shape_cast %31 : vector<1x1x96xf32> to vector<1x96xf32>
    %33 = vector.broadcast %32 : vector<1x96xf32> to vector<8x96xf32>
    %34 = arith.addf %30, %33 : vector<8x96xf32>
    %35 = vector.extract_strided_slice %34 {offsets = [0, 0], sizes = [8, 16], strides = [1, 1]} : vector<8x96xf32> to vector<8x16xf32>
    %36 = arith.truncf %35 : vector<8x16xf32> to vector<8x16xbf16>
    %37 = vector.extract_strided_slice %34 {offsets = [0, 32], sizes = [8, 16], strides = [1, 1]} : vector<8x96xf32> to vector<8x16xf32>
    %38 = arith.truncf %37 : vector<8x16xf32> to vector<8x16xbf16>
    %39 = vector.extract_strided_slice %34 {offsets = [0, 64], sizes = [8, 16], strides = [1, 1]} : vector<8x96xf32> to vector<8x16xf32>
    %40 = arith.truncf %39 : vector<8x16xf32> to vector<8x16xbf16>
    %cst_19 = arith.constant dense<0.000000e+00> : vector<8x8xf32>
    %41 = tpu.matmul %36, %38, %cst_19 {dimension_numbers = #tpu.dot_dimension_numbers<[1], [1], [0], [0], [0, 0, 1, 0], [], []>} : vector<8x16xbf16>, vector<8x16xbf16>, vector<8x8xf32> -> vector<8x8xf32>
    %cst_20 = arith.constant 2.500000e-01 : f32
    %42 = vector.broadcast %cst_20 : f32 to vector<8x8xf32>
    %43 = arith.mulf %41, %42 : vector<8x8xf32>
    %44 = vector.broadcast %26 : vector<1x8xf32> to vector<8x8xf32>
    %45 = arith.addf %43, %44 : vector<8x8xf32>
    %cst_21 = arith.constant dense<0xFF800000> : vector<8xf32>
    %46 = vector.multi_reduction <maximumf>, %45, %cst_21 [1] : vector<8x8xf32> to vector<8xf32>
    %47 = vector.shape_cast %46 : vector<8xf32> to vector<8x1xf32>
    %48 = vector.broadcast %47 : vector<8x1xf32> to vector<8x8xf32>
    %49 = arith.subf %45, %48 : vector<8x8xf32>
    %50 = math.exp %49 : vector<8x8xf32>
    %cst_22 = arith.constant dense<0.000000e+00> : vector<8xf32>
    %51 = vector.multi_reduction <add>, %50, %cst_22 [1] : vector<8x8xf32> to vector<8xf32>
    %52 = vector.shape_cast %51 : vector<8xf32> to vector<8x1xf32>
    %53 = tpu.reciprocal %52 {approx = true} : vector<8x1xf32> -> vector<8x1xf32>
    %54 = vector.broadcast %53 : vector<8x1xf32> to vector<8x8xf32>
    %55 = arith.mulf %50, %54 : vector<8x8xf32>
    %56 = arith.truncf %55 : vector<8x8xf32> to vector<8x8xbf16>
    %cst_23 = arith.constant dense<0.000000e+00> : vector<8x16xf32>
    %57 = tpu.matmul %56, %40, %cst_23 {dimension_numbers = #tpu.dot_dimension_numbers<[1], [0], [0], [1], [0, 0, 1, 1], [], []>} : vector<8x8xbf16>, vector<8x16xbf16>, vector<8x16xf32> -> vector<8x16xf32>
    %58 = vector.extract_strided_slice %34 {offsets = [0, 16], sizes = [8, 16], strides = [1, 1]} : vector<8x96xf32> to vector<8x16xf32>
    %59 = arith.truncf %58 : vector<8x16xf32> to vector<8x16xbf16>
    %60 = vector.extract_strided_slice %34 {offsets = [0, 48], sizes = [8, 16], strides = [1, 1]} : vector<8x96xf32> to vector<8x16xf32>
    %61 = arith.truncf %60 : vector<8x16xf32> to vector<8x16xbf16>
    %62 = vector.extract_strided_slice %34 {offsets = [0, 80], sizes = [8, 16], strides = [1, 1]} : vector<8x96xf32> to vector<8x16xf32>
    %63 = arith.truncf %62 : vector<8x16xf32> to vector<8x16xbf16>
    %cst_24 = arith.constant dense<0.000000e+00> : vector<8x8xf32>
    %64 = tpu.matmul %59, %61, %cst_24 {dimension_numbers = #tpu.dot_dimension_numbers<[1], [1], [0], [0], [0, 0, 1, 0], [], []>} : vector<8x16xbf16>, vector<8x16xbf16>, vector<8x8xf32> -> vector<8x8xf32>
    %cst_25 = arith.constant 2.500000e-01 : f32
    %65 = vector.broadcast %cst_25 : f32 to vector<8x8xf32>
    %66 = arith.mulf %64, %65 : vector<8x8xf32>
    %67 = vector.broadcast %26 : vector<1x8xf32> to vector<8x8xf32>
    %68 = arith.addf %66, %67 : vector<8x8xf32>
    %cst_26 = arith.constant dense<0xFF800000> : vector<8xf32>
    %69 = vector.multi_reduction <maximumf>, %68, %cst_26 [1] : vector<8x8xf32> to vector<8xf32>
    %70 = vector.shape_cast %69 : vector<8xf32> to vector<8x1xf32>
    %71 = vector.broadcast %70 : vector<8x1xf32> to vector<8x8xf32>
    %72 = arith.subf %68, %71 : vector<8x8xf32>
    %73 = math.exp %72 : vector<8x8xf32>
    %cst_27 = arith.constant dense<0.000000e+00> : vector<8xf32>
    %74 = vector.multi_reduction <add>, %73, %cst_27 [1] : vector<8x8xf32> to vector<8xf32>
    %75 = vector.shape_cast %74 : vector<8xf32> to vector<8x1xf32>
    %76 = tpu.reciprocal %75 {approx = true} : vector<8x1xf32> -> vector<8x1xf32>
    %77 = vector.broadcast %76 : vector<8x1xf32> to vector<8x8xf32>
    %78 = arith.mulf %73, %77 : vector<8x8xf32>
    %79 = arith.truncf %78 : vector<8x8xf32> to vector<8x8xbf16>
    %cst_28 = arith.constant dense<0.000000e+00> : vector<8x16xf32>
    %80 = tpu.matmul %79, %63, %cst_28 {dimension_numbers = #tpu.dot_dimension_numbers<[1], [0], [0], [1], [0, 0, 1, 1], [], []>} : vector<8x8xbf16>, vector<8x16xbf16>, vector<8x16xf32> -> vector<8x16xf32>
    %81 = tpu.concatenate %57, %80 in 1 : vector<8x16xf32>, vector<8x16xf32> -> vector<8x32xf32>
    %82 = arith.truncf %81 : vector<8x32xf32> to vector<8x32xbf16>
    %c0_29 = arith.constant 0 : index
    %c0_30 = arith.constant 0 : index
    %c0_31 = arith.constant 0 : index
    %83 = vector.load %arg7[%c0_29, %c0_30, %c0_31] : memref<2x32x32xbf16, #tpu.memory_space<vmem>>, vector<1x32x32xbf16>
    %84 = vector.shape_cast %83 : vector<1x32x32xbf16> to vector<32x32xbf16>
    %cst_32 = arith.constant dense<0.000000e+00> : vector<8x32xf32>
    %85 = tpu.matmul %82, %84, %cst_32 {dimension_numbers = #tpu.dot_dimension_numbers<[1], [0], [0], [1], [0, 0, 1, 1], [], []>} : vector<8x32xbf16>, vector<32x32xbf16>, vector<8x32xf32> -> vector<8x32xf32>
    %c0_33 = arith.constant 0 : index
    %c0_34 = arith.constant 0 : index
    %c0_35 = arith.constant 0 : index
    %86 = vector.load %arg8[%c0_33, %c0_34, %c0_35] : memref<2x1x32xf32, #tpu.memory_space<vmem>>, vector<1x1x32xf32>
    %87 = vector.shape_cast %86 : vector<1x1x32xf32> to vector<1x32xf32>
    %88 = vector.broadcast %87 : vector<1x32xf32> to vector<8x32xf32>
    %89 = arith.addf %85, %88 : vector<8x32xf32>
    %90 = arith.addf %89, %24 : vector<8x32xf32>
    %c0_36 = arith.constant 0 : index
    %c0_37 = arith.constant 0 : index
    %c0_38 = arith.constant 0 : index
    %91 = vector.load %arg9[%c0_36, %c0_37, %c0_38] : memref<2x1x32xf32, #tpu.memory_space<vmem>>, vector<1x1x32xf32>
    %92 = vector.shape_cast %91 : vector<1x1x32xf32> to vector<1x32xf32>
    %c0_39 = arith.constant 0 : index
    %c0_40 = arith.constant 0 : index
    %c0_41 = arith.constant 0 : index
    %93 = vector.load %arg10[%c0_39, %c0_40, %c0_41] : memref<2x1x32xf32, #tpu.memory_space<vmem>>, vector<1x1x32xf32>
    %94 = vector.shape_cast %93 : vector<1x1x32xf32> to vector<1x32xf32>
    %cst_42 = arith.constant dense<0.000000e+00> : vector<8xf32>
    %95 = vector.multi_reduction <add>, %90, %cst_42 [1] : vector<8x32xf32> to vector<8xf32>
    %96 = vector.shape_cast %95 : vector<8xf32> to vector<8x1xf32>
    %cst_43 = arith.constant 3.200000e+01 : f32
    %97 = vector.broadcast %cst_43 : f32 to vector<8x1xf32>
    %98 = arith.divf %96, %97 : vector<8x1xf32>
    %99 = vector.broadcast %98 : vector<8x1xf32> to vector<8x32xf32>
    %100 = arith.subf %90, %99 : vector<8x32xf32>
    %101 = arith.mulf %100, %100 : vector<8x32xf32>
    %cst_44 = arith.constant dense<0.000000e+00> : vector<8xf32>
    %102 = vector.multi_reduction <add>, %101, %cst_44 [1] : vector<8x32xf32> to vector<8xf32>
    %103 = vector.shape_cast %102 : vector<8xf32> to vector<8x1xf32>
    %cst_45 = arith.constant 3.200000e+01 : f32
    %104 = vector.broadcast %cst_45 : f32 to vector<8x1xf32>
    %105 = arith.divf %103, %104 : vector<8x1xf32>
    %106 = vector.broadcast %98 : vector<8x1xf32> to vector<8x32xf32>
    %107 = arith.subf %90, %106 : vector<8x32xf32>
    %cst_46 = arith.constant 9.99999996E-13 : f32
    %108 = vector.broadcast %cst_46 : f32 to vector<8x1xf32>
    %109 = arith.addf %105, %108 : vector<8x1xf32>
    %110 = math.rsqrt %109 : vector<8x1xf32>
    %111 = vector.broadcast %110 : vector<8x1xf32> to vector<8x32xf32>
    %112 = arith.mulf %107, %111 : vector<8x32xf32>
    %113 = vector.broadcast %92 : vector<1x32xf32> to vector<8x32xf32>
    %114 = arith.mulf %112, %113 : vector<8x32xf32>
    %115 = vector.broadcast %94 : vector<1x32xf32> to vector<8x32xf32>
    %116 = arith.addf %114, %115 : vector<8x32xf32>
    %117 = arith.truncf %116 : vector<8x32xf32> to vector<8x32xbf16>
    %c0_47 = arith.constant 0 : index
    %c0_48 = arith.constant 0 : index
    %c0_49 = arith.constant 0 : index
    %118 = vector.load %arg11[%c0_47, %c0_48, %c0_49] : memref<2x32x64xbf16, #tpu.memory_space<vmem>>, vector<1x32x64xbf16>
    %119 = vector.shape_cast %118 : vector<1x32x64xbf16> to vector<32x64xbf16>
    %cst_50 = arith.constant dense<0.000000e+00> : vector<8x64xf32>
    %120 = tpu.matmul %117, %119, %cst_50 {dimension_numbers = #tpu.dot_dimension_numbers<[1], [0], [0], [1], [0, 0, 1, 1], [], []>} : vector<8x32xbf16>, vector<32x64xbf16>, vector<8x64xf32> -> vector<8x64xf32>
    %c0_51 = arith.constant 0 : index
    %c0_52 = arith.constant 0 : index
    %c0_53 = arith.constant 0 : index
    %121 = vector.load %arg12[%c0_51, %c0_52, %c0_53] : memref<2x1x64xf32, #tpu.memory_space<vmem>>, vector<1x1x64xf32>
    %122 = vector.shape_cast %121 : vector<1x1x64xf32> to vector<1x64xf32>
    %123 = vector.broadcast %122 : vector<1x64xf32> to vector<8x64xf32>
    %124 = arith.addf %120, %123 : vector<8x64xf32>
    %125 = arith.mulf %124, %124 : vector<8x64xf32>
    %126 = arith.mulf %124, %125 : vector<8x64xf32>
    %cst_54 = arith.constant 4.471500e-02 : f32
    %127 = vector.broadcast %cst_54 : f32 to vector<8x64xf32>
    %128 = arith.mulf %127, %126 : vector<8x64xf32>
    %129 = arith.addf %124, %128 : vector<8x64xf32>
    %cst_55 = arith.constant 0.797884583 : f32
    %130 = vector.broadcast %cst_55 : f32 to vector<8x64xf32>
    %131 = arith.mulf %130, %129 : vector<8x64xf32>
    %132 = math.tanh %131 : vector<8x64xf32>
    %cst_56 = arith.constant 1.000000e+00 : f32
    %133 = vector.broadcast %cst_56 : f32 to vector<8x64xf32>
    %134 = arith.addf %133, %132 : vector<8x64xf32>
    %cst_57 = arith.constant 5.000000e-01 : f32
    %135 = vector.broadcast %cst_57 : f32 to vector<8x64xf32>
    %136 = arith.mulf %135, %134 : vector<8x64xf32>
    %137 = arith.mulf %124, %136 : vector<8x64xf32>
    %138 = arith.truncf %137 : vector<8x64xf32> to vector<8x64xbf16>
    %c0_58 = arith.constant 0 : index
    %c0_59 = arith.constant 0 : index
    %c0_60 = arith.constant 0 : index
    %139 = vector.load %arg13[%c0_58, %c0_59, %c0_60] : memref<2x64x32xbf16, #tpu.memory_space<vmem>>, vector<1x64x32xbf16>
    %140 = vector.shape_cast %139 : vector<1x64x32xbf16> to vector<64x32xbf16>
    %cst_61 = arith.constant dense<0.000000e+00> : vector<8x32xf32>
    %141 = tpu.matmul %138, %140, %cst_61 {dimension_numbers = #tpu.dot_dimension_numbers<[1], [0], [0], [1], [0, 0, 1, 1], [], []>} : vector<8x64xbf16>, vector<64x32xbf16>, vector<8x32xf32> -> vector<8x32xf32>
    %c0_62 = arith.constant 0 : index
    %c0_63 = arith.constant 0 : index
    %c0_64 = arith.constant 0 : index
    %142 = vector.load %arg14[%c0_62, %c0_63, %c0_64] : memref<2x1x32xf32, #tpu.memory_space<vmem>>, vector<1x1x32xf32>
    %143 = vector.shape_cast %142 : vector<1x1x32xf32> to vector<1x32xf32>
    %144 = vector.broadcast %143 : vector<1x32xf32> to vector<8x32xf32>
    %145 = arith.addf %141, %144 : vector<8x32xf32>
    %146 = arith.addf %145, %116 : vector<8x32xf32>
    %c0_65 = arith.constant 0 : index
    %c0_66 = arith.constant 0 : index
    %c0_67 = arith.constant 0 : index
    %147 = vector.load %arg15[%c0_65, %c0_66, %c0_67] : memref<2x1x32xf32, #tpu.memory_space<vmem>>, vector<1x1x32xf32>
    %148 = vector.shape_cast %147 : vector<1x1x32xf32> to vector<1x32xf32>
    %c0_68 = arith.constant 0 : index
    %c0_69 = arith.constant 0 : index
    %c0_70 = arith.constant 0 : index
    %149 = vector.load %arg16[%c0_68, %c0_69, %c0_70] : memref<2x1x32xf32, #tpu.memory_space<vmem>>, vector<1x1x32xf32>
    %150 = vector.shape_cast %149 : vector<1x1x32xf32> to vector<1x32xf32>
    %cst_71 = arith.constant dense<0.000000e+00> : vector<8xf32>
    %151 = vector.multi_reduction <add>, %146, %cst_71 [1] : vector<8x32xf32> to vector<8xf32>
    %152 = vector.shape_cast %151 : vector<8xf32> to vector<8x1xf32>
    %cst_72 = arith.constant 3.200000e+01 : f32
    %153 = vector.broadcast %cst_72 : f32 to vector<8x1xf32>
    %154 = arith.divf %152, %153 : vector<8x1xf32>
    %155 = vector.broadcast %154 : vector<8x1xf32> to vector<8x32xf32>
    %156 = arith.subf %146, %155 : vector<8x32xf32>
    %157 = arith.mulf %156, %156 : vector<8x32xf32>
    %cst_73 = arith.constant dense<0.000000e+00> : vector<8xf32>
    %158 = vector.multi_reduction <add>, %157, %cst_73 [1] : vector<8x32xf32> to vector<8xf32>
    %159 = vector.shape_cast %158 : vector<8xf32> to vector<8x1xf32>
    %cst_74 = arith.constant 3.200000e+01 : f32
    %160 = vector.broadcast %cst_74 : f32 to vector<8x1xf32>
    %161 = arith.divf %159, %160 : vector<8x1xf32>
    %162 = vector.broadcast %154 : vector<8x1xf32> to vector<8x32xf32>
    %163 = arith.subf %146, %162 : vector<8x32xf32>
    %cst_75 = arith.constant 9.99999996E-13 : f32
    %164 = vector.broadcast %cst_75 : f32 to vector<8x1xf32>
    %165 = arith.addf %161, %164 : vector<8x1xf32>
    %166 = math.rsqrt %165 : vector<8x1xf32>
    %167 = vector.broadcast %166 : vector<8x1xf32> to vector<8x32xf32>
    %168 = arith.mulf %163, %167 : vector<8x32xf32>
    %169 = vector.broadcast %148 : vector<1x32xf32> to vector<8x32xf32>
    %170 = arith.mulf %168, %169 : vector<8x32xf32>
    %171 = vector.broadcast %150 : vector<1x32xf32> to vector<8x32xf32>
    %172 = arith.addf %170, %171 : vector<8x32xf32>
    %173 = arith.truncf %172 : vector<8x32xf32> to vector<8x32xbf16>
    %c1 = arith.constant 1 : index
    %c0_76 = arith.constant 0 : index
    %c0_77 = arith.constant 0 : index
    %174 = vector.load %arg5[%c1, %c0_76, %c0_77] : memref<2x32x96xbf16, #tpu.memory_space<vmem>>, vector<1x32x96xbf16>
    %175 = vector.shape_cast %174 : vector<1x32x96xbf16> to vector<32x96xbf16>
    %cst_78 = arith.constant dense<0.000000e+00> : vector<8x96xf32>
    %176 = tpu.matmul %173, %175, %cst_78 {dimension_numbers = #tpu.dot_dimension_numbers<[1], [0], [0], [1], [0, 0, 1, 1], [], []>} : vector<8x32xbf16>, vector<32x96xbf16>, vector<8x96xf32> -> vector<8x96xf32>
    %c1_79 = arith.constant 1 : index
    %c0_80 = arith.constant 0 : index
    %c0_81 = arith.constant 0 : index
    %177 = vector.load %arg6[%c1_79, %c0_80, %c0_81] : memref<2x1x96xf32, #tpu.memory_space<vmem>>, vector<1x1x96xf32>
    %178 = vector.shape_cast %177 : vector<1x1x96xf32> to vector<1x96xf32>
    %179 = vector.broadcast %178 : vector<1x96xf32> to vector<8x96xf32>
    %180 = arith.addf %176, %179 : vector<8x96xf32>
    %181 = vector.extract_strided_slice %180 {offsets = [0, 0], sizes = [8, 16], strides = [1, 1]} : vector<8x96xf32> to vector<8x16xf32>
    %182 = arith.truncf %181 : vector<8x16xf32> to vector<8x16xbf16>
    %183 = vector.extract_strided_slice %180 {offsets = [0, 32], sizes = [8, 16], strides = [1, 1]} : vector<8x96xf32> to vector<8x16xf32>
    %184 = arith.truncf %183 : vector<8x16xf32> to vector<8x16xbf16>
    %185 = vector.extract_strided_slice %180 {offsets = [0, 64], sizes = [8, 16], strides = [1, 1]} : vector<8x96xf32> to vector<8x16xf32>
    %186 = arith.truncf %185 : vector<8x16xf32> to vector<8x16xbf16>
    %cst_82 = arith.constant dense<0.000000e+00> : vector<8x8xf32>
    %187 = tpu.matmul %182, %184, %cst_82 {dimension_numbers = #tpu.dot_dimension_numbers<[1], [1], [0], [0], [0, 0, 1, 0], [], []>} : vector<8x16xbf16>, vector<8x16xbf16>, vector<8x8xf32> -> vector<8x8xf32>
    %cst_83 = arith.constant 2.500000e-01 : f32
    %188 = vector.broadcast %cst_83 : f32 to vector<8x8xf32>
    %189 = arith.mulf %187, %188 : vector<8x8xf32>
    %190 = vector.broadcast %26 : vector<1x8xf32> to vector<8x8xf32>
    %191 = arith.addf %189, %190 : vector<8x8xf32>
    %cst_84 = arith.constant dense<0xFF800000> : vector<8xf32>
    %192 = vector.multi_reduction <maximumf>, %191, %cst_84 [1] : vector<8x8xf32> to vector<8xf32>
    %193 = vector.shape_cast %192 : vector<8xf32> to vector<8x1xf32>
    %194 = vector.broadcast %193 : vector<8x1xf32> to vector<8x8xf32>
    %195 = arith.subf %191, %194 : vector<8x8xf32>
    %196 = math.exp %195 : vector<8x8xf32>
    %cst_85 = arith.constant dense<0.000000e+00> : vector<8xf32>
    %197 = vector.multi_reduction <add>, %196, %cst_85 [1] : vector<8x8xf32> to vector<8xf32>
    %198 = vector.shape_cast %197 : vector<8xf32> to vector<8x1xf32>
    %199 = tpu.reciprocal %198 {approx = true} : vector<8x1xf32> -> vector<8x1xf32>
    %200 = vector.broadcast %199 : vector<8x1xf32> to vector<8x8xf32>
    %201 = arith.mulf %196, %200 : vector<8x8xf32>
    %202 = arith.truncf %201 : vector<8x8xf32> to vector<8x8xbf16>
    %cst_86 = arith.constant dense<0.000000e+00> : vector<8x16xf32>
    %203 = tpu.matmul %202, %186, %cst_86 {dimension_numbers = #tpu.dot_dimension_numbers<[1], [0], [0], [1], [0, 0, 1, 1], [], []>} : vector<8x8xbf16>, vector<8x16xbf16>, vector<8x16xf32> -> vector<8x16xf32>
    %204 = vector.extract_strided_slice %180 {offsets = [0, 16], sizes = [8, 16], strides = [1, 1]} : vector<8x96xf32> to vector<8x16xf32>
    %205 = arith.truncf %204 : vector<8x16xf32> to vector<8x16xbf16>
    %206 = vector.extract_strided_slice %180 {offsets = [0, 48], sizes = [8, 16], strides = [1, 1]} : vector<8x96xf32> to vector<8x16xf32>
    %207 = arith.truncf %206 : vector<8x16xf32> to vector<8x16xbf16>
    %208 = vector.extract_strided_slice %180 {offsets = [0, 80], sizes = [8, 16], strides = [1, 1]} : vector<8x96xf32> to vector<8x16xf32>
    %209 = arith.truncf %208 : vector<8x16xf32> to vector<8x16xbf16>
    %cst_87 = arith.constant dense<0.000000e+00> : vector<8x8xf32>
    %210 = tpu.matmul %205, %207, %cst_87 {dimension_numbers = #tpu.dot_dimension_numbers<[1], [1], [0], [0], [0, 0, 1, 0], [], []>} : vector<8x16xbf16>, vector<8x16xbf16>, vector<8x8xf32> -> vector<8x8xf32>
    %cst_88 = arith.constant 2.500000e-01 : f32
    %211 = vector.broadcast %cst_88 : f32 to vector<8x8xf32>
    %212 = arith.mulf %210, %211 : vector<8x8xf32>
    %213 = vector.broadcast %26 : vector<1x8xf32> to vector<8x8xf32>
    %214 = arith.addf %212, %213 : vector<8x8xf32>
    %cst_89 = arith.constant dense<0xFF800000> : vector<8xf32>
    %215 = vector.multi_reduction <maximumf>, %214, %cst_89 [1] : vector<8x8xf32> to vector<8xf32>
    %216 = vector.shape_cast %215 : vector<8xf32> to vector<8x1xf32>
    %217 = vector.broadcast %216 : vector<8x1xf32> to vector<8x8xf32>
    %218 = arith.subf %214, %217 : vector<8x8xf32>
    %219 = math.exp %218 : vector<8x8xf32>
    %cst_90 = arith.constant dense<0.000000e+00> : vector<8xf32>
    %220 = vector.multi_reduction <add>, %219, %cst_90 [1] : vector<8x8xf32> to vector<8xf32>
    %221 = vector.shape_cast %220 : vector<8xf32> to vector<8x1xf32>
    %222 = tpu.reciprocal %221 {approx = true} : vector<8x1xf32> -> vector<8x1xf32>
    %223 = vector.broadcast %222 : vector<8x1xf32> to vector<8x8xf32>
    %224 = arith.mulf %219, %223 : vector<8x8xf32>
    %225 = arith.truncf %224 : vector<8x8xf32> to vector<8x8xbf16>
    %cst_91 = arith.constant dense<0.000000e+00> : vector<8x16xf32>
    %226 = tpu.matmul %225, %209, %cst_91 {dimension_numbers = #tpu.dot_dimension_numbers<[1], [0], [0], [1], [0, 0, 1, 1], [], []>} : vector<8x8xbf16>, vector<8x16xbf16>, vector<8x16xf32> -> vector<8x16xf32>
    %227 = tpu.concatenate %203, %226 in 1 : vector<8x16xf32>, vector<8x16xf32> -> vector<8x32xf32>
    %228 = arith.truncf %227 : vector<8x32xf32> to vector<8x32xbf16>
    %c1_92 = arith.constant 1 : index
    %c0_93 = arith.constant 0 : index
    %c0_94 = arith.constant 0 : index
    %229 = vector.load %arg7[%c1_92, %c0_93, %c0_94] : memref<2x32x32xbf16, #tpu.memory_space<vmem>>, vector<1x32x32xbf16>
    %230 = vector.shape_cast %229 : vector<1x32x32xbf16> to vector<32x32xbf16>
    %cst_95 = arith.constant dense<0.000000e+00> : vector<8x32xf32>
    %231 = tpu.matmul %228, %230, %cst_95 {dimension_numbers = #tpu.dot_dimension_numbers<[1], [0], [0], [1], [0, 0, 1, 1], [], []>} : vector<8x32xbf16>, vector<32x32xbf16>, vector<8x32xf32> -> vector<8x32xf32>
    %c1_96 = arith.constant 1 : index
    %c0_97 = arith.constant 0 : index
    %c0_98 = arith.constant 0 : index
    %232 = vector.load %arg8[%c1_96, %c0_97, %c0_98] : memref<2x1x32xf32, #tpu.memory_space<vmem>>, vector<1x1x32xf32>
    %233 = vector.shape_cast %232 : vector<1x1x32xf32> to vector<1x32xf32>
    %234 = vector.broadcast %233 : vector<1x32xf32> to vector<8x32xf32>
    %235 = arith.addf %231, %234 : vector<8x32xf32>
    %236 = arith.addf %235, %172 : vector<8x32xf32>
    %c1_99 = arith.constant 1 : index
    %c0_100 = arith.constant 0 : index
    %c0_101 = arith.constant 0 : index
    %237 = vector.load %arg9[%c1_99, %c0_100, %c0_101] : memref<2x1x32xf32, #tpu.memory_space<vmem>>, vector<1x1x32xf32>
    %238 = vector.shape_cast %237 : vector<1x1x32xf32> to vector<1x32xf32>
    %c1_102 = arith.constant 1 : index
    %c0_103 = arith.constant 0 : index
    %c0_104 = arith.constant 0 : index
    %239 = vector.load %arg10[%c1_102, %c0_103, %c0_104] : memref<2x1x32xf32, #tpu.memory_space<vmem>>, vector<1x1x32xf32>
    %240 = vector.shape_cast %239 : vector<1x1x32xf32> to vector<1x32xf32>
    %cst_105 = arith.constant dense<0.000000e+00> : vector<8xf32>
    %241 = vector.multi_reduction <add>, %236, %cst_105 [1] : vector<8x32xf32> to vector<8xf32>
    %242 = vector.shape_cast %241 : vector<8xf32> to vector<8x1xf32>
    %cst_106 = arith.constant 3.200000e+01 : f32
    %243 = vector.broadcast %cst_106 : f32 to vector<8x1xf32>
    %244 = arith.divf %242, %243 : vector<8x1xf32>
    %245 = vector.broadcast %244 : vector<8x1xf32> to vector<8x32xf32>
    %246 = arith.subf %236, %245 : vector<8x32xf32>
    %247 = arith.mulf %246, %246 : vector<8x32xf32>
    %cst_107 = arith.constant dense<0.000000e+00> : vector<8xf32>
    %248 = vector.multi_reduction <add>, %247, %cst_107 [1] : vector<8x32xf32> to vector<8xf32>
    %249 = vector.shape_cast %248 : vector<8xf32> to vector<8x1xf32>
    %cst_108 = arith.constant 3.200000e+01 : f32
    %250 = vector.broadcast %cst_108 : f32 to vector<8x1xf32>
    %251 = arith.divf %249, %250 : vector<8x1xf32>
    %252 = vector.broadcast %244 : vector<8x1xf32> to vector<8x32xf32>
    %253 = arith.subf %236, %252 : vector<8x32xf32>
    %cst_109 = arith.constant 9.99999996E-13 : f32
    %254 = vector.broadcast %cst_109 : f32 to vector<8x1xf32>
    %255 = arith.addf %251, %254 : vector<8x1xf32>
    %256 = math.rsqrt %255 : vector<8x1xf32>
    %257 = vector.broadcast %256 : vector<8x1xf32> to vector<8x32xf32>
    %258 = arith.mulf %253, %257 : vector<8x32xf32>
    %259 = vector.broadcast %238 : vector<1x32xf32> to vector<8x32xf32>
    %260 = arith.mulf %258, %259 : vector<8x32xf32>
    %261 = vector.broadcast %240 : vector<1x32xf32> to vector<8x32xf32>
    %262 = arith.addf %260, %261 : vector<8x32xf32>
    %263 = arith.truncf %262 : vector<8x32xf32> to vector<8x32xbf16>
    %c1_110 = arith.constant 1 : index
    %c0_111 = arith.constant 0 : index
    %c0_112 = arith.constant 0 : index
    %264 = vector.load %arg11[%c1_110, %c0_111, %c0_112] : memref<2x32x64xbf16, #tpu.memory_space<vmem>>, vector<1x32x64xbf16>
    %265 = vector.shape_cast %264 : vector<1x32x64xbf16> to vector<32x64xbf16>
    %cst_113 = arith.constant dense<0.000000e+00> : vector<8x64xf32>
    %266 = tpu.matmul %263, %265, %cst_113 {dimension_numbers = #tpu.dot_dimension_numbers<[1], [0], [0], [1], [0, 0, 1, 1], [], []>} : vector<8x32xbf16>, vector<32x64xbf16>, vector<8x64xf32> -> vector<8x64xf32>
    %c1_114 = arith.constant 1 : index
    %c0_115 = arith.constant 0 : index
    %c0_116 = arith.constant 0 : index
    %267 = vector.load %arg12[%c1_114, %c0_115, %c0_116] : memref<2x1x64xf32, #tpu.memory_space<vmem>>, vector<1x1x64xf32>
    %268 = vector.shape_cast %267 : vector<1x1x64xf32> to vector<1x64xf32>
    %269 = vector.broadcast %268 : vector<1x64xf32> to vector<8x64xf32>
    %270 = arith.addf %266, %269 : vector<8x64xf32>
    %271 = arith.mulf %270, %270 : vector<8x64xf32>
    %272 = arith.mulf %270, %271 : vector<8x64xf32>
    %cst_117 = arith.constant 4.471500e-02 : f32
    %273 = vector.broadcast %cst_117 : f32 to vector<8x64xf32>
    %274 = arith.mulf %273, %272 : vector<8x64xf32>
    %275 = arith.addf %270, %274 : vector<8x64xf32>
    %cst_118 = arith.constant 0.797884583 : f32
    %276 = vector.broadcast %cst_118 : f32 to vector<8x64xf32>
    %277 = arith.mulf %276, %275 : vector<8x64xf32>
    %278 = math.tanh %277 : vector<8x64xf32>
    %cst_119 = arith.constant 1.000000e+00 : f32
    %279 = vector.broadcast %cst_119 : f32 to vector<8x64xf32>
    %280 = arith.addf %279, %278 : vector<8x64xf32>
    %cst_120 = arith.constant 5.000000e-01 : f32
    %281 = vector.broadcast %cst_120 : f32 to vector<8x64xf32>
    %282 = arith.mulf %281, %280 : vector<8x64xf32>
    %283 = arith.mulf %270, %282 : vector<8x64xf32>
    %284 = arith.truncf %283 : vector<8x64xf32> to vector<8x64xbf16>
    %c1_121 = arith.constant 1 : index
    %c0_122 = arith.constant 0 : index
    %c0_123 = arith.constant 0 : index
    %285 = vector.load %arg13[%c1_121, %c0_122, %c0_123] : memref<2x64x32xbf16, #tpu.memory_space<vmem>>, vector<1x64x32xbf16>
    %286 = vector.shape_cast %285 : vector<1x64x32xbf16> to vector<64x32xbf16>
    %cst_124 = arith.constant dense<0.000000e+00> : vector<8x32xf32>
    %287 = tpu.matmul %284, %286, %cst_124 {dimension_numbers = #tpu.dot_dimension_numbers<[1], [0], [0], [1], [0, 0, 1, 1], [], []>} : vector<8x64xbf16>, vector<64x32xbf16>, vector<8x32xf32> -> vector<8x32xf32>
    %c1_125 = arith.constant 1 : index
    %c0_126 = arith.constant 0 : index
    %c0_127 = arith.constant 0 : index
    %288 = vector.load %arg14[%c1_125, %c0_126, %c0_127] : memref<2x1x32xf32, #tpu.memory_space<vmem>>, vector<1x1x32xf32>
    %289 = vector.shape_cast %288 : vector<1x1x32xf32> to vector<1x32xf32>
    %290 = vector.broadcast %289 : vector<1x32xf32> to vector<8x32xf32>
    %291 = arith.addf %287, %290 : vector<8x32xf32>
    %292 = arith.addf %291, %262 : vector<8x32xf32>
    %c1_128 = arith.constant 1 : index
    %c0_129 = arith.constant 0 : index
    %c0_130 = arith.constant 0 : index
    %293 = vector.load %arg15[%c1_128, %c0_129, %c0_130] : memref<2x1x32xf32, #tpu.memory_space<vmem>>, vector<1x1x32xf32>
    %294 = vector.shape_cast %293 : vector<1x1x32xf32> to vector<1x32xf32>
    %c1_131 = arith.constant 1 : index
    %c0_132 = arith.constant 0 : index
    %c0_133 = arith.constant 0 : index
    %295 = vector.load %arg16[%c1_131, %c0_132, %c0_133] : memref<2x1x32xf32, #tpu.memory_space<vmem>>, vector<1x1x32xf32>
    %296 = vector.shape_cast %295 : vector<1x1x32xf32> to vector<1x32xf32>
    %cst_134 = arith.constant dense<0.000000e+00> : vector<8xf32>
    %297 = vector.multi_reduction <add>, %292, %cst_134 [1] : vector<8x32xf32> to vector<8xf32>
    %298 = vector.shape_cast %297 : vector<8xf32> to vector<8x1xf32>
    %cst_135 = arith.constant 3.200000e+01 : f32
    %299 = vector.broadcast %cst_135 : f32 to vector<8x1xf32>
    %300 = arith.divf %298, %299 : vector<8x1xf32>
    %301 = vector.broadcast %300 : vector<8x1xf32> to vector<8x32xf32>
    %302 = arith.subf %292, %301 : vector<8x32xf32>
    %303 = arith.mulf %302, %302 : vector<8x32xf32>
    %cst_136 = arith.constant dense<0.000000e+00> : vector<8xf32>
    %304 = vector.multi_reduction <add>, %303, %cst_136 [1] : vector<8x32xf32> to vector<8xf32>
    %305 = vector.shape_cast %304 : vector<8xf32> to vector<8x1xf32>
    %cst_137 = arith.constant 3.200000e+01 : f32
    %306 = vector.broadcast %cst_137 : f32 to vector<8x1xf32>
    %307 = arith.divf %305, %306 : vector<8x1xf32>
    %308 = vector.broadcast %300 : vector<8x1xf32> to vector<8x32xf32>
    %309 = arith.subf %292, %308 : vector<8x32xf32>
    %cst_138 = arith.constant 9.99999996E-13 : f32
    %310 = vector.broadcast %cst_138 : f32 to vector<8x1xf32>
    %311 = arith.addf %307, %310 : vector<8x1xf32>
    %312 = math.rsqrt %311 : vector<8x1xf32>
    %313 = vector.broadcast %312 : vector<8x1xf32> to vector<8x32xf32>
    %314 = arith.mulf %309, %313 : vector<8x32xf32>
    %315 = vector.broadcast %294 : vector<1x32xf32> to vector<8x32xf32>
    %316 = arith.mulf %314, %315 : vector<8x32xf32>
    %317 = vector.broadcast %296 : vector<1x32xf32> to vector<8x32xf32>
    %318 = arith.addf %316, %317 : vector<8x32xf32>
    %319 = vector.extract_strided_slice %318 {offsets = [0, 0], sizes = [1, 32], strides = [1, 1]} : vector<8x32xf32> to vector<1x32xf32>
    %320 = arith.truncf %319 : vector<1x32xf32> to vector<1x32xbf16>
    %c0_139 = arith.constant 0 : index
    %c0_140 = arith.constant 0 : index
    %321 = vector.load %arg17[%c0_139, %c0_140] : memref<32x32xbf16, #tpu.memory_space<vmem>>, vector<32x32xbf16>
    %cst_141 = arith.constant dense<0.000000e+00> : vector<1x32xf32>
    %322 = tpu.matmul %320, %321, %cst_141 {dimension_numbers = #tpu.dot_dimension_numbers<[1], [0], [0], [1], [0, 0, 1, 1], [], []>} : vector<1x32xbf16>, vector<32x32xbf16>, vector<1x32xf32> -> vector<1x32xf32>
    %c0_142 = arith.constant 0 : index
    %c0_143 = arith.constant 0 : index
    %323 = vector.load %arg18[%c0_142, %c0_143] : memref<1x32xf32, #tpu.memory_space<vmem>>, vector<1x32xf32>
    %324 = arith.addf %322, %323 : vector<1x32xf32>
    %325 = math.tanh %324 : vector<1x32xf32>
    %c0_144 = arith.constant 0 : index
    %c0_145 = arith.constant 0 : index
    %c0_146 = arith.constant 0 : index
    %326 = vector.load %arg19[%c0_144, %c0_145, %c0_146] : memref<1x1x32xf32, #tpu.memory_space<vmem>>, vector<1x1x32xf32>
    %327 = vector.shape_cast %326 : vector<1x1x32xf32> to vector<1x32xf32>
    %328 = vector.shape_cast %325 : vector<1x32xf32> to vector<1x1x32xf32>
    tpu.vector_store %arg19[%c0_144, %c0_145, %c0_146], %328 {strides = array<i32>} : memref<1x1x32xf32, #tpu.memory_space<vmem>>, vector<1x1x32xf32>,
    return
  }
  func.func @transform_0(%arg0: i32) -> (i32, i32) {
    %c0_i32 = arith.constant 0 : i32
    %c0_i32_0 = arith.constant 0 : i32
    return %arg0, %c0_i32 : i32, i32
  }
  func.func @transform_1(%arg0: i32) -> (i32, i32, i32) {
    %c0_i32 = arith.constant 0 : i32
    %c0_i32_0 = arith.constant 0 : i32
    %c0_i32_1 = arith.constant 0 : i32
    return %arg0, %c0_i32, %c0_i32_0 : i32, i32, i32
  }
  func.func @transform_2(%arg0: i32) -> (i32, i32) {
    %c0_i32 = arith.constant 0 : i32
    %c0_i32_0 = arith.constant 0 : i32
    %c0_i32_1 = arith.constant 0 : i32
    return %c0_i32, %c0_i32_0 : i32, i32
  }
  func.func @transform_3(%arg0: i32) -> (i32, i32) {
    %c0_i32 = arith.constant 0 : i32
    %c0_i32_0 = arith.constant 0 : i32
    %c0_i32_1 = arith.constant 0 : i32
    return %c0_i32, %c0_i32_0 : i32, i32
  }
  func.func @transform_4(%arg0: i32) -> (i32, i32, i32) {
    %c0_i32 = arith.constant 0 : i32
    %c0_i32_0 = arith.constant 0 : i32
    %c0_i32_1 = arith.constant 0 : i32
    %c0_i32_2 = arith.constant 0 : i32
    return %c0_i32, %c0_i32_0, %c0_i32_1 : i32, i32, i32
  }
  func.func @transform_5(%arg0: i32) -> (i32, i32, i32) {
    %c0_i32 = arith.constant 0 : i32
    %c0_i32_0 = arith.constant 0 : i32
    %c0_i32_1 = arith.constant 0 : i32
    %c0_i32_2 = arith.constant 0 : i32
    return %c0_i32, %c0_i32_0, %c0_i32_1 : i32, i32, i32
  }
  func.func @transform_6(%arg0: i32) -> (i32, i32, i32) {
    %c0_i32 = arith.constant 0 : i32
    %c0_i32_0 = arith.constant 0 : i32
    %c0_i32_1 = arith.constant 0 : i32
    %c0_i32_2 = arith.constant 0 : i32
    return %c0_i32, %c0_i32_0, %c0_i32_1 : i32, i32, i32
  }
  func.func @transform_7(%arg0: i32) -> (i32, i32, i32) {
    %c0_i32 = arith.constant 0 : i32
    %c0_i32_0 = arith.constant 0 : i32
    %c0_i32_1 = arith.constant 0 : i32
    %c0_i32_2 = arith.constant 0 : i32
    return %c0_i32, %c0_i32_0, %c0_i32_1 : i32, i32, i32
  }
  func.func @transform_8(%arg0: i32) -> (i32, i32, i32) {
    %c0_i32 = arith.constant 0 : i32
    %c0_i32_0 = arith.constant 0 : i32
    %c0_i32_1 = arith.constant 0 : i32
    %c0_i32_2 = arith.constant 0 : i32
    return %c0_i32, %c0_i32_0, %c0_i32_1 : i32, i32, i32
  }
  func.func @transform_9(%arg0: i32) -> (i32, i32, i32) {
    %c0_i32 = arith.constant 0 : i32
    %c0_i32_0 = arith.constant 0 : i32
    %c0_i32_1 = arith.constant 0 : i32
    %c0_i32_2 = arith.constant 0 : i32
    return %c0_i32, %c0_i32_0, %c0_i32_1 : i32, i32, i32
  }
  func.func @transform_10(%arg0: i32) -> (i32, i32, i32) {
    %c0_i32 = arith.constant 0 : i32
    %c0_i32_0 = arith.constant 0 : i32
    %c0_i32_1 = arith.constant 0 : i32
    %c0_i32_2 = arith.constant 0 : i32
    return %c0_i32, %c0_i32_0, %c0_i32_1 : i32, i32, i32
  }
  func.func @transform_11(%arg0: i32) -> (i32, i32, i32) {
    %c0_i32 = arith.constant 0 : i32
    %c0_i32_0 = arith.constant 0 : i32
    %c0_i32_1 = arith.constant 0 : i32
    %c0_i32_2 = arith.constant 0 : i32
    return %c0_i32, %c0_i32_0, %c0_i32_1 : i32, i32, i32
  }
  func.func @transform_12(%arg0: i32) -> (i32, i32, i32) {
    %c0_i32 = arith.constant 0 : i32
    %c0_i32_0 = arith.constant 0 : i32
    %c0_i32_1 = arith.constant 0 : i32
    %c0_i32_2 = arith.constant 0 : i32
    return %c0_i32, %c0_i32_0, %c0_i32_1 : i32, i32, i32
  }
  func.func @transform_13(%arg0: i32) -> (i32, i32, i32) {
    %c0_i32 = arith.constant 0 : i32
    %c0_i32_0 = arith.constant 0 : i32
    %c0_i32_1 = arith.constant 0 : i32
    %c0_i32_2 = arith.constant 0 : i32
    return %c0_i32, %c0_i32_0, %c0_i32_1 : i32, i32, i32
  }
  func.func @transform_14(%arg0: i32) -> (i32, i32, i32) {
    %c0_i32 = arith.constant 0 : i32
    %c0_i32_0 = arith.constant 0 : i32
    %c0_i32_1 = arith.constant 0 : i32
    %c0_i32_2 = arith.constant 0 : i32
    return %c0_i32, %c0_i32_0, %c0_i32_1 : i32, i32, i32
  }
  func.func @transform_15(%arg0: i32) -> (i32, i32, i32) {
    %c0_i32 = arith.constant 0 : i32
    %c0_i32_0 = arith.constant 0 : i32
    %c0_i32_1 = arith.constant 0 : i32
    %c0_i32_2 = arith.constant 0 : i32
    return %c0_i32, %c0_i32_0, %c0_i32_1 : i32, i32, i32
  }
  func.func @transform_16(%arg0: i32) -> (i32, i32) {
    %c0_i32 = arith.constant 0 : i32
    %c0_i32_0 = arith.constant 0 : i32
    %c0_i32_1 = arith.constant 0 : i32
    return %c0_i32, %c0_i32_0 : i32, i32
  }
  func.func @transform_17(%arg0: i32) -> (i32, i32) {
    %c0_i32 = arith.constant 0 : i32
    %c0_i32_0 = arith.constant 0 : i32
    %c0_i32_1 = arith.constant 0 : i32
    return %c0_i32, %c0_i32_0 : i32, i32
  }
  func.func @transform_18(%arg0: i32) -> (i32, i32, i32) {
    %c0_i32 = arith.constant 0 : i32
    %c0_i32_0 = arith.constant 0 : i32
    %c0_i32_1 = arith.constant 0 : i32
    return %arg0, %c0_i32, %c0_i32_0 : i32, i32, i32
  }
}

</mosaic_0001>

<bundles_post_ra>
// kernel: big_model_forward.1
= control target key start
LH: loop header
LB: loop body
LE: loop exit
PB: predicated region body
PF: predicated region fallthrough
CT: control target
= control target key end

     0   :  { %s2841_s0 = inlined_call_operand.vmem [shape: f32[16,32], index: 0, kind: input, shape index: {}]   ;;  %s2842_s1 = inlined_call_operand.vmem [shape: f32[2,1,8], index: 1, kind: input, shape index: {}]   ;;  %s2843_s2 = inlined_call_operand.vmem [shape: f32[1,32], index: 2, kind: input, shape index: {}]   ;;  %s2844_s3 = inlined_call_operand.vmem [shape: f32[1,32], index: 3, kind: input, shape index: {}]   ;;  %s2845_s4 = inlined_call_operand.vmem [shape: bf16[2,32,96], index: 4, kind: input, shape index: {}]   ;;  %s2846_s5 = inlined_call_operand.vmem [shape: f32[2,1,96], index: 5, kind: input, shape index: {}]   ;;  %s2847_s6 = inlined_call_operand.vmem [shape: bf16[2,32,32], index: 6, kind: input, shape index: {}]   ;;  %s2848_s7 = inlined_call_operand.vmem [shape: f32[2,1,32], index: 7, kind: input, shape index: {}]   ;;  %s2849_s8 = inlined_call_operand.vmem [shape: f32[2,1,32], index: 8, kind: input, shape index: {}]   ;;  %s2850_s9 = inlined_call_operand.vmem [shape: f32[2,1,32], index: 9, kind: input, shape index: {}]   ;;  %s2851_s10 = inlined_call_operand.vmem [shape: bf16[2,32,64], index: 10, kind: input, shape index: {}]   ;;  %s2852_s11 = inlined_call_operand.vmem [shape: f32[2,1,64], index: 11, kind: input, shape index: {}]   ;;  %s2853_s12 = inlined_call_operand.vmem [shape: bf16[2,64,32], index: 12, kind: input, shape index: {}]   ;;  %s2854_s13 = inlined_call_operand.vmem [shape: f32[2,1,32], index: 13, kind: input, shape index: {}]   ;;  %s2855_s14 = inlined_call_operand.vmem [shape: f32[2,1,32], index: 14, kind: input, shape index: {}]   ;;  %s2856_s15 = inlined_call_operand.vmem [shape: f32[2,1,32], index: 15, kind: input, shape index: {}]   ;;  %s2857_s16 = inlined_call_operand.vmem [shape: bf16[32,32], index: 16, kind: input, shape index: {}]   ;;  %s2858_s17 = inlined_call_operand.vmem [shape: f32[1,32], index: 17, kind: input, shape index: {}]   ;;  %s2859_s18 = inlined_call_operand.hbm [shape: f32[2,1,32], index: 18, kind: output, shape index: {}]  }
   0x1   :  { %2866 = sst [smem:[#allocation7_spill]] %s2841_s0 }
   0x2   :  { %2867 = sst [smem:[#allocation8_spill]] %s2842_s1 }
   0x3   :  { %2868 = sst [smem:[#allocation9_spill]] %s2843_s2 }
   0x4   :  { %2869 = sst [smem:[#allocation10_spill]] %s2844_s3 }
   0x5   :  { %2870 = sst [smem:[#allocation11_spill]] %s2845_s4 }
   0x6   :  { %2871 = sst [smem:[#allocation12_spill]] %s2846_s5 }
   0x7   :  { %23 = vsyncpa [#allocation3], 0 }
   0x8   :  { %25 = vsyncpa [#allocation3 + $0x1], 0  ;;  %s2481_s27 = smov 0   ;;  %s2483_s28 = smov 0  }
   0x9   :  { %s2485_s29 = smov 0   ;;  %s2487_s30 = smov 0  }
   0xa LB: > { %2872 = sst [smem:[#allocation5_spill]] %s2371_s29  ;;  %s2502_s0 = sadd.s32 4294967295, %s2375_s30   ;;  %s2375_s30 = sphi %s2487_s30, %s2891_s30   ;;  %s2371_s29 = sphi %s2485_s29, %s2888_s29   ;;  %s2367_s28 = sphi %s2483_s28, %s2890_s28   ;;  %s2363_s27 = sphi %s2481_s27, %s2889_s27  }
   0xb   : > { %s1945_s19 = sadd.s32 4294967294, %s2375_s30   ;;  %s2506_s1 = sadd.s32 1, %s2375_s30  }
   0xc   : > { %s426_s20 = sadd.s32 1, %s2371_s29  ;;  %s423_s21 = ssub.s32 %s2375_s30, %s2506_s1 }
   0xd   : > { %p436_p0 = scmp.ne.s32.totalorder %s2371_s29, %s2367_s28  ;;  %p424_p1 = scmp.eq.s32.totalorder %s423_s21, 0 }
   0xe   : > { %p437_p2 = scmp.eq.s32.totalorder %s2502_s0, 1  ;;  %p442_p3 = scmp.ne.s32.totalorder %s2367_s28, %s2363_s27 }
   0xf   : > { %p443_p4 = scmp.eq.s32.totalorder %s1945_s19, 1  ;;  %p1948_p7 = scmp.ge.s32.totalorder %s2375_s30, 1 }
  0x10   : > { %s2517_s22 = scalar_select %p424_p1, %s2371_s29, %s426_s20  }
  0x11   : > { %p2519_p5 = por %p437_p2, %p436_p0  ;;  %p2523_p6 = por %p443_p4, %p442_p3 }
  0x12   : > { %2873 = sst [smem:[#allocation6_spill]] %s2517_s22  ;;  %p522_p8 = scmp.lt.s32.totalorder %s2375_s30, 3 }
  0x14   : > { %p523_p9 = pnand %p1948_p7, %p522_p8 }
  0x15   : > { %p577_p10 = scmp.lt.s32.totalorder (!%p523_p9), %s2502_s0, 1  ;;  %s2876_s20 = sld [smem:[#allocation7_spill]] (!%p523_p9) }
  0x16   : > { %526 = sbr.rel (%p523_p9) target bundleno = 5346 (0x14e2), region = 92  ;;  %s2877_s4 = sld [smem:[#allocation11_spill]] (!%p523_p9) }
  0x17   : > { %s2878_s19 = sld [smem:[#allocation9_spill]] (!%p523_p9)  ;;  %s2864_s29 = smov (!%p523_p9), 112  }
  0x18   : > { %s2879_s3 = sld [smem:[#allocation10_spill]] (!%p523_p9)  ;;  %s2865_s22 = smov (!%p523_p9), 96  }
  0x19   : > { %s2880_s5 = sld [smem:[#allocation12_spill]] (!%p523_p9) }
  0x1b   : > { %s2531_s24 = scalar_select %p577_p10, %s2502_s0, 1  ;;  %vm588_vm0 = vcmask 261120   ;;  %v2377_v8 = vmov 0.0   ;;  %vm2378_vm1 = vmmov 0   ;;  %vm689_vm2 = vcmask 130048  }
  0x1c   : > { %v2261_v7 = vld [vmem:[%s2877_s4 + $0x8] sm:$0xff]   ;;  %2086 = vmatprep.subr.bf16.mxu0 %v2377_v8  ;;  %2090 = vmatprep.mubr.msk.bf16.mxu0 %vm2378_vm1, %v2377_v8  ;;  %v2262_v9 = vld [vmem:[%s2877_s4] sm:$0xff]   ;;  %vm744_vm3 = vcmask 64512   ;;  %vm762_vm4 = vcmask 1043456   ;;  %vm1136_vm5 = vcmask 523264   ;;  %vm1866_vm6 = vcmask 253952  }
  0x1d   : > { %s1949_s25 = sshll.u32 %s2531_s24, 3  ;;  %2087 = vmatpush3.bf16.msra.mxu0 %v2261_v7  ;;  %2094 = vmatprep.subr.bf16.mxu1 %v2377_v8  ;;  %v1950_v14 = vld [vmem:[%s2878_s19] ss:$0 sm:$0xff]  ;;  %s2381_s19 = smov 80  }
  0x1e   : > { %s580_s21 = scalar_lea.vmem %s2876_s20, %s1949_s25  ;;  %2088 = vmatprep.subr.bf16.mxu0 %v2377_v8  ;;  %2096 = vmatprep.mubr.msk.bf16.mxu1 %vm2378_vm1, %v2377_v8  ;;  %v1951_v16 = vld [vmem:[%s2879_s3] ss:$0 sm:$0xff]  ;;  %s2881_s25 = sld [smem:[#allocation8_spill]] }
  0x1f   : > { %v585_v0 = vld [vmem:[%s580_s21] sm:$0xff]  ;;  %s2862_s20 = smov 64   ;;  %s2882_s21 = smov 96  }
  0x20   : > { %v589_v1 = vsel %vm588_vm0, %v585_v0, 0.0  ;;  %v1952_v20 = vld [vmem:[%s2880_s5] ss:$0 sm:$0xff] }
  0x21   : > { %590 = vadd.xlane.f32.xlu0 %v589_v1  ;;  %2089 = vmatpush3.bf16.msra.mxu0 %v2262_v9 }
  0x22   : > { %2100 = vmatprep.subr.bf16.mxu0 %v2377_v8 }
  0x24   : > { %s583_s26 = scalar_lea.vmem %s2881_s25, %s2531_s24  ;;  %s2861_s24 = smov 48  }
  0x25   : > { %v2586_v32 = vld [vmem:[%s583_s26] ss:$0 sm:$0xff] }
  0xaa   : > { %v591_v2 = vpop.xlane.xlu0 %590 }
  0xab   : > { %v593_v3 = vmul.f32 0.03125, %v591_v2 }
  0xad   : > { %v594_v4 = vsub.f32 %v585_v0, %v593_v3 }
  0xaf   : > { %v595_v5 = vmul.f32 %v594_v4, %v594_v4 }
  0xb1   : > { %v596_v6 = vsel %vm588_vm0, %v595_v5, 0.0  ;;  %v2263_v5 = vld [vmem:[%s2847_s6 + $0x8] sm:$0xff]  }
  0xb2   : > { %597 = vadd.xlane.f32.xlu0 %v596_v6  ;;  %v2264_v6 = vld [vmem:[%s2847_s6] sm:$0xff]  }
 0x13b   : > { %v598_v10 = vpop.xlane.xlu0 %597 }
 0x13c   : > { %v599_v11 = vmul.f32 0.03125, %v598_v10 }
 0x13e   : > { %v600_v12 = vadd.f32 1e-12, %v599_v11 }
 0x140   : > { %2283 = vrsqrt.f32 %v600_v12 }
 0x14d   : > { %v2284_v13 = vpop.eup %2283 }
 0x14e   : > { %v602_v15 = vmul.f32 %v2284_v13, %v594_v4 }
 0x150   : > { %v609_v17 = vmul.f32 %v1950_v14, %v602_v15 }
 0x152   : > { %v2559_v18 = vadd.f32 %v1951_v16, %v609_v17 }
 0x154   : > { %v618_v19 = vpack.c.bf16 %v2559_v18, %v2559_v18 }
 0x156   : > { %2091 = vmatmul.mubr.msk.bf16.vlgmr.msra.gmra.mxu0 %vm588_vm0, %v618_v19 }
 0x157   : > { %2102 = vmatprep.mubr.msk.bf16.mxu0 %vm2378_vm1, %v2377_v8 }
 0x216   : > { %v679_v21 = vpop.f32.mrf.mxu0 }
 0x217   : > { %v680_v22 = vadd.f32 %v1952_v20, %v679_v21  ;;  %v1961_v20 = vld [vmem:[%s2848_s7] ss:$0 sm:$0xff] }
 0x218   : > { %v2092_v23 = vpop.f32.mrf.mxu0 }
 0x219   : > { %v685_v24 = vpack.c.bf16 %v680_v22, %v680_v22 }
 0x21a   : > { %v682_v25 = vpop.f32.mrf.mxu0 }
 0x21b   : > { %806 = vrot.lane.b32.xlu0 %v685_v24, %s2864_s29  ;;  %687 = vrot.lane.b32.xlu1 %v685_v24, %s2865_s22  ;;  %s2883_s29 = smov 112   ;;  %s2885_s22 = smov 48  }
 0x21c   : > { %v2093_v26 = vpop.f32.mrf.mxu0 }
 0x21f   : > { %808 = vrot.lane.b32.xlu1 %v685_v24, %s2381_s19 }
 0x28d   : > { %v688_v27 = vpop.permute.xlu1 %687  ;;  %v807_v31 = vpop.permute.xlu0 %806 }
 0x28e   : > { %v694_v28 = vsel %vm689_vm2, %v688_v27, 0 }
 0x28f   : > { %2095 = vmatpush3.bf16.xpose.msra.mxu1 %v694_v28 }
 0x290   : > { %2106 = vmatprep.subr.bf16.mxu1 %v2377_v8 }
 0x291   : > { %v809_v29 = vpop.permute.xlu1 %808 }
 0x292   : > { %v814_v30 = vsel %vm689_vm2, %v809_v29, 0 }
 0x296   : > { %2097 = vmatmul.mubr.msk.bf16.vlgmr.msra.gmra.mxu1 %vm689_vm2, %v685_v24 }
 0x297   : > { %2107 = vmatpush3.bf16.xpose.msra.mxu1 %v814_v30  ;;  %2108 = vmatprep.mubr.msk.bf16.mxu1 %vm2378_vm1, %v2377_v8 }
 0x298   : > { %2118 = vmatprep.subr.bf16.mxu1 %v2377_v8 }
 0x29e   : > { %2109 = vmatmul.mubr.msk.bf16.vlgmr.msra.gmra.mxu1 %vm689_vm2, %v807_v31 }
 0x29f   : > { %2122 = vmatprep.mubr.msk.bf16.mxu1 %vm2378_vm1, %v2377_v8  ;;  %2119 = vmatpush3.bf16.msra.mxu1 %v2263_v5 }
 0x2a0   : > { %2120 = vmatprep.subr.bf16.mxu1 %v2377_v8 }
 0x2a3   : > { %2121 = vmatpush3.bf16.msra.mxu1 %v2264_v6 }
 0x2a4   : > { %2134 = vmatprep.subr.bf16.mxu1 %v2377_v8 }
 0x356   : > { %v730_v33 = vpop.f32.mrf.mxu1 }
 0x357   : > { %v736_v34 = vmul.f32 0.25, %v730_v33 }
 0x358   : > { %v2098_v35 = vpop.f32.mrf.mxu1 }
 0x359   : > { %v743_v36 = vadd.f32 %v2586_v32, %v736_v34  ;;  %v2265_v34 = vld [vmem:[%s2851_s10 + $0x8] sm:$0xff]  }
 0x35a   : > { %v733_v37 = vpop.f32.mrf.mxu1 }
 0x35b   : > { %v745_v38 = vsel %vm744_vm3, %v743_v36, -inf }
 0x35c   : > { %746 = vmax.xlane.f32.xlu1 %v745_v38  ;;  %v2099_v39 = vpop.f32.mrf.mxu1 }
 0x35d   : > { %v1965_v39 = vld [vmem:[%s2849_s8] ss:$0 sm:$0xff] }
 0x35e   : > { %v850_v40 = vpop.f32.mrf.mxu1 }
 0x35f   : > { %v856_v41 = vmul.f32 0.25, %v850_v40 }
 0x360   : > { %v2110_v42 = vpop.f32.mrf.mxu1 }
 0x361   : > { %v857_v43 = vadd.f32 %v2586_v32, %v856_v41  ;;  %v1966_v41 = vld [vmem:[%s2850_s9] ss:$0 sm:$0xff] }
 0x362   : > { %v853_v44 = vpop.f32.mrf.mxu1 }
 0x363   : > { %v858_v45 = vsel %vm744_vm3, %v857_v43, -inf }
 0x364   : > { %859 = vmax.xlane.f32.xlu0 %v858_v45  ;;  %v2111_v46 = vpop.f32.mrf.mxu1  ;;  %v2267_v45 = vld [vmem:[%s2853_s12 + $0x18] sm:$0xff]  }
 0x365   : > { %v2268_v46 = vld [vmem:[%s2853_s12 + $0x10] sm:$0xff]  }
 0x37a   : > { %870 = vrot.lane.b32.xlu0 %v685_v24, %s2861_s24 }
 0x3e5   : > { %v747_v47 = vpop.xlane.xlu1 %746 }
 0x3e6   : > { %v748_v48 = vsub.f32 %v743_v36, %v747_v47  ;;  %v2269_v47 = vld [vmem:[%s2853_s12 + $0x8] sm:$0xff]  }
 0x3e8   : > { %v749_v49 = vmul.f32 1.442695, %v748_v48  ;;  %v2270_v48 = vld [vmem:[%s2853_s12] sm:$0xff]  }
 0x3ea   : > { %2285 = vpow2.f32 %v749_v49  ;;  %v1967_v49 = vld [vmem:[%s2852_s11] ss:$0 sm:$0xff] }
 0x3ed   : > { %v860_v50 = vpop.xlane.xlu0 %859 }
 0x3ee   : > { %v861_v51 = vsub.f32 %v857_v43, %v860_v50 }
 0x3f0   : > { %v862_v52 = vmul.f32 1.442695, %v861_v51 }
 0x3f1   : > { %v871_v63 = vpop.permute.xlu0 %870 }
 0x3f2   : > { %2287 = vpow2.f32 %v862_v52  ;;  %v876_v1 = vsel %vm762_vm4, %v871_v63, 0 }
 0x3f7   : > { %v2286_v53 = vpop.eup %2285 }
 0x3f8   : > { %v751_v54 = vsel %vm744_vm3, %v2286_v53, 0.0 }
 0x3f9   : > { %752 = vadd.xlane.f32.xlu1 %v751_v54 }
 0x3ff   : > { %v2288_v55 = vpop.eup %2287 }
 0x400   : > { %v864_v56 = vsel %vm744_vm3, %v2288_v55, 0.0 }
 0x401   : > { %865 = vadd.xlane.f32.xlu1 %v864_v56 }
 0x412   : > { %757 = vrot.lane.b32.xlu1 %v685_v24, %s2862_s20  ;;  %s2863_s20 = smov 16  }
 0x482   : > { %v753_v57 = vpop.xlane.xlu1 %752 }
 0x483   : > { %2289 = vrcp.f32 %v753_v57 }
 0x48a   : > { %v866_v58 = vpop.xlane.xlu1 %865 }
 0x48b   : > { %2291 = vrcp.f32 %v866_v58 }
 0x48e   : > { %v758_v59 = vpop.permute.xlu1 %757 }
 0x48f   : > { %v764_v60 = vsel %vm762_vm4, %v758_v59, 0 }
 0x490   : > { %v2290_v61 = vpop.eup %2289  ;;  %2101 = vmatpush3.bf16.msra.mxu0 %v764_v60 }
 0x491   : > { %2112 = vmatprep.subr.bf16.mxu0 %v2377_v8  ;;  %v755_v62 = vmul.f32 %v2290_v61, %v2286_v53 }
 0x493   : > { %v756_v0 = vpack.c.bf16 %v755_v62, %v755_v62 }
 0x495   : > { %2103 = vmatmul.mubr.msk.bf16.vlgmr.msra.gmra.mxu0 %vm744_vm3, %v756_v0 }
 0x496   : > { %2113 = vmatpush3.bf16.msra.mxu0 %v876_v1  ;;  %2114 = vmatprep.mubr.msk.bf16.mxu0 %vm2378_vm1, %v2377_v8  ;;  %v1971_v1 = vld [vmem:[%s2854_s13] ss:$0 sm:$0xff] }
 0x497   : > { %2126 = vmatprep.subr.bf16.mxu0 %v2377_v8 }
 0x498   : > { %v2292_v2 = vpop.eup %2291 }
 0x499   : > { %v868_v3 = vmul.f32 %v2292_v2, %v2288_v55 }
 0x49b   : > { %v869_v4 = vpack.c.bf16 %v868_v3, %v868_v3 }
 0x49d   : > { %2115 = vmatmul.mubr.msk.bf16.vlgmr.msra.gmra.mxu0 %vm744_vm3, %v869_v4 }
 0x49e   : > { %2130 = vmatprep.mubr.msk.bf16.mxu0 %vm2378_vm1, %v2377_v8  ;;  %2127 = vmatpush3.bf16.msra.mxu0 %v2265_v34 }
 0x49f   : > { %2128 = vmatprep.subr.bf16.mxu0 %v2377_v8 }
 0x555   : > { %v800_v7 = vpop.f32.mrf.mxu0 }
 0x557   : > { %v2104_v9 = vpop.f32.mrf.mxu0 }
 0x559   : > { %v803_v10 = vpop.f32.mrf.mxu0 }
 0x55b   : > { %v2105_v11 = vpop.f32.mrf.mxu0 }
 0x55d   : > { %v912_v12 = vpop.f32.mrf.mxu0 }
 0x55e   : > { %919 = vrot.lane.b32.xlu1 %v912_v12, %s2863_s20 }
 0x55f   : > { %v2116_v13 = vpop.f32.mrf.mxu0 }
 0x561   : > { %v915_v14 = vpop.f32.mrf.mxu0 }
 0x563   : > { %v2117_v15 = vpop.f32.mrf.mxu0 }
 0x564   : > { %v2271_v15 = vld [vmem:[%s2877_s4 + $0x18] sm:$0xff]  }
 0x5d0   : > { %v920_v16 = vpop.permute.xlu1 %919 }
 0x5d1   : > { %v922_v17 = vsel %vm689_vm2, %v800_v7, %v920_v16  ;;  %v2272_v16 = vld [vmem:[%s2877_s4 + $0x10] sm:$0xff]   ;;  %s2385_s4 = smov [#allocation2]  }
 0x5d2   : > { %v923_v19 = vpack.c.bf16 %v922_v17, %v922_v17 }
 0x5d4   : > { %2123 = vmatmul.mubr.msk.bf16.vlgmr.msra.gmra.mxu1 %vm588_vm0, %v923_v19 }
 0x5d5   : > { %2142 = vmatprep.mubr.msk.bf16.mxu1 %vm2378_vm1, %v2377_v8  ;;  %2135 = vmatpush3.bf16.msra.mxu1 %v2267_v45 }
 0x5d6   : > { %2136 = vmatprep.subr.bf16.mxu1 %v2377_v8 }
 0x5d9   : > { %2137 = vmatpush3.bf16.msra.mxu1 %v2268_v46 }
 0x5da   : > { %2138 = vmatprep.subr.bf16.mxu1 %v2377_v8 }
 0x5dd   : > { %2139 = vmatpush3.bf16.msra.mxu1 %v2269_v47 }
 0x5de   : > { %2140 = vmatprep.subr.bf16.mxu1 %v2377_v8 }
 0x5e1   : > { %2141 = vmatpush3.bf16.msra.mxu1 %v2270_v48 }
 0x5e2   : > { %2160 = vmatprep.subr.bf16.mxu1 %v2377_v8 }
 0x694   : > { %v984_v21 = vpop.f32.mrf.mxu1 }
 0x695   : > { %v985_v22 = vadd.f32 %v1961_v20, %v984_v21 }
 0x696   : > { %v2124_v23 = vpop.f32.mrf.mxu1 }
 0x697   : > { %v990_v24 = vadd.f32 %v985_v22, %v2559_v18  ;;  %v2266_v18 = vld [vmem:[%s2851_s10] sm:$0xff]  }
 0x698   : > { %v987_v25 = vpop.f32.mrf.mxu1  ;;  %2129 = vmatpush3.bf16.msra.mxu0 %v2266_v18  ;;  %v1977_v22 = vld [vmem:[%s2855_s14] ss:$0 sm:$0xff] }
 0x699   : > { %v993_v26 = vsel %vm588_vm0, %v990_v24, 0.0  ;;  %2146 = vmatprep.subr.bf16.mxu0 %v2377_v8 }
 0x69a   : > { %994 = vadd.xlane.f32.xlu1 %v993_v26  ;;  %v2125_v27 = vpop.f32.mrf.mxu1 }
 0x723   : > { %v995_v28 = vpop.xlane.xlu1 %994 }
 0x724   : > { %v996_v29 = vmul.f32 0.03125, %v995_v28  ;;  %v1984_v28 = vld [vmem:[%s2880_s5 + $0x1] ss:$0 sm:$0xff]  ;;  %s2319_s5 = sshll.u32 %s2385_s4, 4  ;;  %s2320_s5 = int_to_ptr.vmem [resolvable:$false] %s2319_s5 }
 0x726   : > { %v997_v30 = vsub.f32 %v990_v24, %v996_v29  ;;  %v1978_v24 = vld [vmem:[%s2856_s15] ss:$0 sm:$0xff] }
 0x728   : > { %v998_v31 = vmul.f32 %v997_v30, %v997_v30 }
 0x72a   : > { %v999_v33 = vsel %vm588_vm0, %v998_v31, 0.0 }
 0x72b   : > { %1000 = vadd.xlane.f32.xlu0 %v999_v33 }
 0x7b4   : > { %v1001_v35 = vpop.xlane.xlu0 %1000 }
 0x7b5   : > { %v1002_v36 = vmul.f32 0.03125, %v1001_v35 }
 0x7b7   : > { %v1003_v37 = vadd.f32 1e-12, %v1002_v36 }
 0x7b9   : > { %2293 = vrsqrt.f32 %v1003_v37 }
 0x7c6   : > { %v2294_v38 = vpop.eup %2293 }
 0x7c7   : > { %v1005_v40 = vmul.f32 %v2294_v38, %v997_v30 }
 0x7c9   : > { %v1012_v42 = vmul.f32 %v1965_v39, %v1005_v40 }
 0x7cb   : > { %v1019_v43 = vadd.f32 %v1966_v41, %v1012_v42 }
 0x7cd   : > { %v1020_v44 = vpack.c.bf16 %v1019_v43, %v1019_v43 }
 0x7cf   : > { %2131 = vmatmul.mubr.msk.bf16.vlgmr.msra.gmra.mxu0 %vm588_vm0, %v1020_v44 }
 0x7d0   : > { %2150 = vmatprep.mubr.msk.bf16.mxu0 %vm2378_vm1, %v2377_v8  ;;  %2147 = vmatpush3.bf16.msra.mxu0 %v2271_v15 }
 0x7d1   : > { %2148 = vmatprep.subr.bf16.mxu0 %v2377_v8 }
 0x7d4   : > { %2149 = vmatpush3.bf16.msra.mxu0 %v2272_v16 }
 0x7d5   : > { %2154 = vmatprep.subr.bf16.mxu0 %v2377_v8 }
 0x88f   : > { %v1081_v50 = vpop.f32.mrf.mxu0 }
 0x890   : > { %v1082_v51 = vadd.f32 %v1967_v49, %v1081_v50 }
 0x891   : > { %v2132_v52 = vpop.f32.mrf.mxu0 }
 0x892   : > { %v1087_v53 = vmul.f32 %v1082_v51, %v1082_v51 }
 0x893   : > { %v1084_v54 = vpop.f32.mrf.mxu0 }
 0x894   : > { %v1088_v55 = vmul.f32 %v1087_v53, %v1082_v51 }
 0x895   : > { %v2133_v56 = vpop.f32.mrf.mxu0 }
 0x896   : > { %v1089_v57 = vmul.f32 0.044715, %v1088_v55 }
 0x898   : > { %v1090_v58 = vadd.f32 %v1089_v57, %v1082_v51 }
 0x89a   : > { %v1091_v59 = vmul.f32 0.7978846, %v1090_v58 }
 0x89c   : > { %2295 = vtanh.f32 %v1091_v59 }
 0x8a9   : > { %v2296_v60 = vpop.eup %2295 }
 0x8aa   : > { %v1093_v61 = vadd.f32 1.0, %v2296_v60 }
 0x8ac   : > { %v1094_v62 = vmul.f32 0.5, %v1093_v61 }
 0x8ae   : > { %v1095_v63 = vmul.f32 %v1094_v62, %v1082_v51 }
 0x8b0   : > { %v1096_v0 = vpack.c.bf16 %v1095_v63, %v1095_v63 }
 0x8b2   : > { %2143 = vmatmul.mubr.msk.bf16.vlgmr.msra.gmra.mxu1 %vm1136_vm5, %v1096_v0 }
 0x8b3   : > { %2162 = vmatprep.mubr.msk.bf16.mxu1 %vm2378_vm1, %v2377_v8 }
 0x972   : > { %v1174_v2 = vpop.f32.mrf.mxu1 }
 0x973   : > { %v1175_v3 = vadd.f32 %v1971_v1, %v1174_v2 }
 0x974   : > { %v2144_v4 = vpop.f32.mrf.mxu1 }
 0x975   : > { %v1180_v5 = vadd.f32 %v1175_v3, %v1019_v43 }
 0x976   : > { %v1177_v6 = vpop.f32.mrf.mxu1 }
 0x977   : > { %v1183_v7 = vsel %vm588_vm0, %v1180_v5, 0.0 }
 0x978   : > { %1184 = vadd.xlane.f32.xlu1 %v1183_v7  ;;  %v2145_v9 = vpop.f32.mrf.mxu1 }
 0xa01   : > { %v1185_v10 = vpop.xlane.xlu1 %1184 }
 0xa02   : > { %v1186_v11 = vmul.f32 0.03125, %v1185_v10 }
 0xa04   : > { %v1187_v12 = vsub.f32 %v1180_v5, %v1186_v11 }
 0xa06   : > { %v1188_v13 = vmul.f32 %v1187_v12, %v1187_v12 }
 0xa08   : > { %v1189_v14 = vsel %vm588_vm0, %v1188_v13, 0.0  ;;  %v2274_v13 = vld [vmem:[%s2847_s6 + $0x10] sm:$0xff]  }
 0xa09   : > { %1190 = vadd.xlane.f32.xlu1 %v1189_v14 }
 0xa92   : > { %v1191_v17 = vpop.xlane.xlu1 %1190 }
 0xa93   : > { %v1192_v19 = vmul.f32 0.03125, %v1191_v17 }
 0xa95   : > { %v1193_v20 = vadd.f32 1e-12, %v1192_v19 }
 0xa97   : > { %2297 = vrsqrt.f32 %v1193_v20 }
 0xaa4   : > { %v2298_v21 = vpop.eup %2297 }
 0xaa5   : > { %v1195_v23 = vmul.f32 %v2298_v21, %v1187_v12  ;;  %v2273_v12 = vld [vmem:[%s2847_s6 + $0x18] sm:$0xff]  }
 0xaa7   : > { %v1202_v25 = vmul.f32 %v1977_v22, %v1195_v23 }
 0xaa9   : > { %v2683_v26 = vadd.f32 %v1978_v24, %v1202_v25 }
 0xaab   : > { %v1210_v27 = vpack.c.bf16 %v2683_v26, %v2683_v26 }
 0xaad   : > { %2151 = vmatmul.mubr.msk.bf16.vlgmr.msra.gmra.mxu0 %vm588_vm0, %v1210_v27  ;;  %v1997_v27 = vld [vmem:[%s2848_s7 + $0x1] ss:$0 sm:$0xff] }
 0xaae   : > { %2156 = vmatprep.mubr.msk.bf16.mxu0 %vm2378_vm1, %v2377_v8 }
 0xb6d   : > { %v1273_v29 = vpop.f32.mrf.mxu0 }
 0xb6e   : > { %v1274_v30 = vadd.f32 %v1984_v28, %v1273_v29 }
 0xb6f   : > { %v2152_v31 = vpop.f32.mrf.mxu0 }
 0xb70   : > { %v1279_v33 = vpack.c.bf16 %v1274_v30, %v1274_v30 }
 0xb71   : > { %v1276_v34 = vpop.f32.mrf.mxu0 }
 0xb72   : > { %1393 = vrot.lane.b32.xlu1 %v1279_v33, %s2381_s19  ;;  %1281 = vrot.lane.b32.xlu0 %v1279_v33, %s2882_s21  ;;  %s2884_s19 = smov 64   ;;  %s2886_s21 = smov 16  }
 0xb73   : > { %v2153_v18 = vpop.f32.mrf.mxu0 }
 0xb76   : > { %1391 = vrot.lane.b32.xlu1 %v1279_v33, %s2883_s29  ;;  %s575_s29 = sand.u32 1, %s2367_s28  }
 0xb77   : > { %s1869_s24 = scalar_lea.sflag [#allocation3], %s575_s29 }
 0xbe4   : > { %v1282_v35 = vpop.permute.xlu0 %1281  ;;  %v1394_v37 = vpop.permute.xlu1 %1393 }
 0xbe5   : > { %v1287_v36 = vsel %vm689_vm2, %v1282_v35, 0  ;;  %v1399_v38 = vsel %vm689_vm2, %v1394_v37, 0 }
 0xbe6   : > { %2155 = vmatpush3.bf16.xpose.msra.mxu0 %v1287_v36 }
 0xbe7   : > { %2166 = vmatprep.subr.bf16.mxu0 %v2377_v8 }
 0xbe8   : > { %v1392_v39 = vpop.permute.xlu1 %1391 }
 0xbed   : > { %2157 = vmatmul.mubr.msk.bf16.vlgmr.msra.gmra.mxu0 %vm689_vm2, %v1279_v33 }
 0xbee   : > { %2167 = vmatpush3.bf16.xpose.msra.mxu0 %v1399_v38  ;;  %2168 = vmatprep.mubr.msk.bf16.mxu0 %vm2378_vm1, %v2377_v8 }
 0xbef   : > { %2178 = vmatprep.subr.bf16.mxu0 %v2377_v8 }
 0xbf5   : > { %2169 = vmatmul.mubr.msk.bf16.vlgmr.msra.gmra.mxu0 %vm689_vm2, %v1392_v39 }
 0xbf6   : > { %2182 = vmatprep.mubr.msk.bf16.mxu0 %vm2378_vm1, %v2377_v8  ;;  %2179 = vmatpush3.bf16.msra.mxu0 %v2273_v12 }
 0xbf7   : > { %2180 = vmatprep.subr.bf16.mxu0 %v2377_v8 }
 0xbfa   : > { %2181 = vmatpush3.bf16.msra.mxu0 %v2274_v13 }
 0xbfb   : > { %2194 = vmatprep.subr.bf16.mxu0 %v2377_v8 }
 0xcad   : > { %v1323_v40 = vpop.f32.mrf.mxu0 }
 0xcae   : > { %v1329_v41 = vmul.f32 0.25, %v1323_v40  ;;  %v2275_v40 = vld [vmem:[%s2851_s10 + $0x18] sm:$0xff]  }
 0xcaf   : > { %v2158_v42 = vpop.f32.mrf.mxu0 }
 0xcb0   : > { %v1330_v43 = vadd.f32 %v2586_v32, %v1329_v41 }
 0xcb1   : > { %v1326_v44 = vpop.f32.mrf.mxu0 }
 0xcb2   : > { %v1331_v45 = vsel %vm744_vm3, %v1330_v43, -inf }
 0xcb3   : > { %1332 = vmax.xlane.f32.xlu0 %v1331_v45  ;;  %v2159_v46 = vpop.f32.mrf.mxu0  ;;  %v2003_v45 = vld [vmem:[%s2849_s8 + $0x1] ss:$0 sm:$0xff] }
 0xcb5   : > { %v1435_v47 = vpop.f32.mrf.mxu0 }
 0xcb6   : > { %v1441_v48 = vmul.f32 0.25, %v1435_v47  ;;  %v2004_v47 = vld [vmem:[%s2850_s9 + $0x1] ss:$0 sm:$0xff] }
 0xcb7   : > { %v2170_v49 = vpop.f32.mrf.mxu0 }
 0xcb8   : > { %v1442_v50 = vadd.f32 %v2586_v32, %v1441_v48 }
 0xcb9   : > { %v1438_v51 = vpop.f32.mrf.mxu0 }
 0xcba   : > { %v1443_v52 = vsel %vm744_vm3, %v1442_v50, -inf  ;;  %v2277_v51 = vld [vmem:[%s2853_s12 + $0x38] sm:$0xff]  }
 0xcbb   : > { %1444 = vmax.xlane.f32.xlu1 %v1443_v52  ;;  %v2171_v53 = vpop.f32.mrf.mxu0  ;;  %v2278_v52 = vld [vmem:[%s2853_s12 + $0x30] sm:$0xff]  }
 0xcbc   : > { %v2279_v53 = vld [vmem:[%s2853_s12 + $0x28] sm:$0xff]  }
 0xccc   : > { %1343 = vrot.lane.b32.xlu1 %v1279_v33, %s2884_s19  ;;  %s2036_s19 = sshll.u32 %s2502_s0, 4  ;;  %s2321_s0 = scalar_lea.vmem %s2320_s5, 32 }
 0xccd   : > { %s2806_s3 = scalar_lea.hbm %s2859_s18, %s2036_s19 }
 0xd3c   : > { %v1333_v54 = vpop.xlane.xlu0 %1332 }
 0xd3d   : > { %v1334_v55 = vsub.f32 %v1330_v43, %v1333_v54  ;;  %v2280_v54 = vld [vmem:[%s2853_s12 + $0x20] sm:$0xff]  }
 0xd3f   : > { %v1335_v56 = vmul.f32 1.442695, %v1334_v55  ;;  %v2010_v55 = vld [vmem:[%s2852_s11 + $0x1] ss:$0 sm:$0xff] }
 0xd41   : > { %2299 = vpow2.f32 %v1335_v56 }
 0xd44   : > { %v1445_v57 = vpop.xlane.xlu1 %1444 }
 0xd45   : > { %v1446_v58 = vsub.f32 %v1442_v50, %v1445_v57 }
 0xd47   : > { %v1447_v59 = vmul.f32 1.442695, %v1446_v58 }
 0xd48   : > { %v1344_v60 = vpop.permute.xlu1 %1343 }
 0xd49   : > { %2301 = vpow2.f32 %v1447_v59  ;;  %v1349_v61 = vsel %vm762_vm4, %v1344_v60, 0 }
 0xd4a   : > { %2161 = vmatpush3.bf16.msra.mxu1 %v1349_v61 }
 0xd4b   : > { %2172 = vmatprep.subr.bf16.mxu1 %v2377_v8 }
 0xd4e   : > { %v2300_v32 = vpop.eup %2299 }
 0xd4f   : > { %v1337_v62 = vsel %vm744_vm3, %v2300_v32, 0.0 }
 0xd50   : > { %1338 = vadd.xlane.f32.xlu0 %v1337_v62 }
 0xd56   : > { %v2302_v63 = vpop.eup %2301 }
 0xd57   : > { %v1449_v0 = vsel %vm744_vm3, %v2302_v63, 0.0 }
 0xd58   : > { %1450 = vadd.xlane.f32.xlu0 %v1449_v0 }
 0xd6e   : > { %1455 = vrot.lane.b32.xlu0 %v1279_v33, %s2885_s22  ;;  %s576_s22 = scalar_lea.vmem [#allocation2], %s575_s29 }
 0xd6f   : > { %s1881_s20 = sshll.u32 %s576_s22, 4  ;;  %s1882_s20 = int_to_ptr.vmem [resolvable:$true] %s1881_s20 }
 0xd70   : > { %p2322_p0 = scmp.lt.s32.totalorder %s1882_s20, %s2320_s5 }
 0xdd9   : > { %v1339_v1 = vpop.xlane.xlu0 %1338 }
 0xdda   : > { %2303 = vrcp.f32 %v1339_v1 }
 0xde1   : > { %v1451_v2 = vpop.xlane.xlu0 %1450 }
 0xde2   : > { %2305 = vrcp.f32 %v1451_v2 }
 0xde5   : > { %v1456_v5 = vpop.permute.xlu0 %1455 }
 0xde6   : > { %v1461_v7 = vsel %vm762_vm4, %v1456_v5, 0 }
 0xde7   : > { %v2304_v3 = vpop.eup %2303 }
 0xde8   : > { %v1341_v4 = vmul.f32 %v2304_v3, %v2300_v32 }
 0xdea   : > { %v1342_v6 = vpack.c.bf16 %v1341_v4, %v1341_v4 }
 0xdec   : > { %2163 = vmatmul.mubr.msk.bf16.vlgmr.msra.gmra.mxu1 %vm744_vm3, %v1342_v6  ;;  %v2023_v6 = vld [vmem:[%s2854_s13 + $0x1] ss:$0 sm:$0xff] }
 0xded   : > { %2173 = vmatpush3.bf16.msra.mxu1 %v1461_v7  ;;  %2174 = vmatprep.mubr.msk.bf16.mxu1 %vm2378_vm1, %v2377_v8 }
 0xdee   : > { %2186 = vmatprep.subr.bf16.mxu1 %v2377_v8 }
 0xdef   : > { %v2306_v9 = vpop.eup %2305 }
 0xdf0   : > { %v1453_v10 = vmul.f32 %v2306_v9, %v2302_v63 }
 0xdf2   : > { %v1454_v11 = vpack.c.bf16 %v1453_v10, %v1453_v10 }
 0xdf4   : > { %2175 = vmatmul.mubr.msk.bf16.vlgmr.msra.gmra.mxu1 %vm744_vm3, %v1454_v11 }
 0xdf5   : > { %2190 = vmatprep.mubr.msk.bf16.mxu1 %vm2378_vm1, %v2377_v8  ;;  %2187 = vmatpush3.bf16.msra.mxu1 %v2275_v40 }
 0xdf6   : > { %2188 = vmatprep.subr.bf16.mxu1 %v2377_v8 }
 0xeac   : > { %v1385_v14 = vpop.f32.mrf.mxu1 }
 0xeae   : > { %v2164_v15 = vpop.f32.mrf.mxu1 }
 0xeb0   : > { %v1388_v16 = vpop.f32.mrf.mxu1 }
 0xeb2   : > { %v2165_v17 = vpop.f32.mrf.mxu1 }
 0xeb4   : > { %v1497_v19 = vpop.f32.mrf.mxu1 }
 0xeb5   : > { %1504 = vrot.lane.b32.xlu1 %v1497_v19, %s2886_s21  ;;  %s2315_s21 = scalar_lea.vmem %s1882_s20, 16 }
 0xeb6   : > { %v2176_v20 = vpop.f32.mrf.mxu1  ;;  %p2316_p11 = scmp.ne.s32.totalorder %s1882_s20, %s2315_s21  ;;  %p2323_p1 = scmp.lt.s32.totalorder %s2321_s0, %s2315_s21 }
 0xeb8   : > { %v1500_v21 = vpop.f32.mrf.mxu1  ;;  %p2317_p12 = pnand %p2316_p11, %p2519_p5  ;;  %p2324_p2 = por %p2323_p1, %p2322_p0 }
 0xeb9   : > { %v2281_v21 = vld [vmem:[%s2857_s16 + $0x8] sm:$0xff]  }
 0xeba   : > { %v2177_v22 = vpop.f32.mrf.mxu1  ;;  %p2318_p13 = pneg %p2317_p12 }
 0xebb   : > { %v2282_v22 = vld [vmem:[%s2857_s16] sm:$0xff]  }
 0xebc   : > { %p2325_p3 = pnand %p2324_p2, %p2318_p13 }
 0xf27   : > { %v1505_v23 = vpop.permute.xlu1 %1504 }
 0xf28   : > { %v1507_v24 = vsel %vm689_vm2, %v1385_v14, %v1505_v23 }
 0xf29   : > { %v1508_v25 = vpack.c.bf16 %v1507_v24, %v1507_v24 }
 0xf2b   : > { %2183 = vmatmul.mubr.msk.bf16.vlgmr.msra.gmra.mxu0 %vm588_vm0, %v1508_v25 }
 0xf2c   : > { %2202 = vmatprep.mubr.msk.bf16.mxu0 %vm2378_vm1, %v2377_v8  ;;  %2195 = vmatpush3.bf16.msra.mxu0 %v2277_v51 }
 0xf2d   : > { %2196 = vmatprep.subr.bf16.mxu0 %v2377_v8 }
 0xf30   : > { %2197 = vmatpush3.bf16.msra.mxu0 %v2278_v52 }
 0xf31   : > { %2198 = vmatprep.subr.bf16.mxu0 %v2377_v8 }
 0xf34   : > { %2199 = vmatpush3.bf16.msra.mxu0 %v2279_v53 }
 0xf35   : > { %2200 = vmatprep.subr.bf16.mxu0 %v2377_v8 }
 0xf38   : > { %2201 = vmatpush3.bf16.msra.mxu0 %v2280_v54 }
 0xfeb   : > { %v1571_v28 = vpop.f32.mrf.mxu0 }
 0xfec   : > { %v1572_v29 = vadd.f32 %v1997_v27, %v1571_v28  ;;  %v2031_v28 = vld [vmem:[%s2855_s14 + $0x1] ss:$0 sm:$0xff] }
 0xfed   : > { %v2184_v30 = vpop.f32.mrf.mxu0 }
 0xfee   : > { %v1577_v31 = vadd.f32 %v1572_v29, %v2683_v26  ;;  %v2276_v26 = vld [vmem:[%s2851_s10 + $0x10] sm:$0xff]   ;;  %v2032_v30 = vld [vmem:[%s2856_s15 + $0x1] ss:$0 sm:$0xff] }
 0xfef   : > { %v1574_v33 = vpop.f32.mrf.mxu0  ;;  %2189 = vmatpush3.bf16.msra.mxu1 %v2276_v26 }
 0xff0   : > { %v1582_v34 = vsel %vm588_vm0, %v1577_v31, 0.0  ;;  %2206 = vmatprep.subr.bf16.mxu1 %v2377_v8 }
 0xff1   : > { %1583 = vadd.xlane.f32.xlu1 %v1582_v34  ;;  %v2185_v18 = vpop.f32.mrf.mxu0  ;;  %v1809_v34 = vld [vmem:[%s2858_s17] sm:$0x1] }
0x107a   : > { %v1584_v35 = vpop.xlane.xlu1 %1583 }
0x107b   : > { %v1585_v36 = vmul.f32 0.03125, %v1584_v35 }
0x107d   : > { %v1586_v37 = vsub.f32 %v1577_v31, %v1585_v36 }
0x107f   : > { %v1587_v38 = vmul.f32 %v1586_v37, %v1586_v37 }
0x1081   : > { %v1588_v39 = vsel %vm588_vm0, %v1587_v38, 0.0 }
0x1082   : > { %1589 = vadd.xlane.f32.xlu0 %v1588_v39 }
0x110b   : > { %v1590_v41 = vpop.xlane.xlu0 %1589 }
0x110c   : > { %v1591_v42 = vmul.f32 0.03125, %v1590_v41 }
0x110e   : > { %v1592_v43 = vadd.f32 1e-12, %v1591_v42 }
0x1110   : > { %2307 = vrsqrt.f32 %v1592_v43 }
0x111d   : > { %v2308_v44 = vpop.eup %2307 }
0x111e   : > { %v1594_v46 = vmul.f32 %v2308_v44, %v1586_v37 }
0x1120   : > { %v1601_v48 = vmul.f32 %v2003_v45, %v1594_v46 }
0x1122   : > { %v1608_v49 = vadd.f32 %v2004_v47, %v1601_v48 }
0x1124   : > { %v1609_v50 = vpack.c.bf16 %v1608_v49, %v1608_v49 }
0x1126   : > { %2191 = vmatmul.mubr.msk.bf16.vlgmr.msra.gmra.mxu1 %vm588_vm0, %v1609_v50 }
0x1127   : > { %2210 = vmatprep.mubr.msk.bf16.mxu1 %vm2378_vm1, %v2377_v8  ;;  %2207 = vmatpush3.bf16.msra.mxu1 %v2281_v21 }
0x1128   : > { %2208 = vmatprep.subr.bf16.mxu1 %v2377_v8 }
0x112b   : > { %2209 = vmatpush3.bf16.msra.mxu1 %v2282_v22 }
0x11e6   : > { %v1672_v56 = vpop.f32.mrf.mxu1 }
0x11e7   : > { %v1673_v57 = vadd.f32 %v2010_v55, %v1672_v56 }
0x11e8   : > { %v2192_v58 = vpop.f32.mrf.mxu1 }
0x11e9   : > { %v1678_v59 = vmul.f32 %v1673_v57, %v1673_v57 }
0x11ea   : > { %v1675_v60 = vpop.f32.mrf.mxu1 }
0x11eb   : > { %v1679_v61 = vmul.f32 %v1678_v59, %v1673_v57 }
0x11ec   : > { %v2193_v32 = vpop.f32.mrf.mxu1 }
0x11ed   : > { %v1680_v62 = vmul.f32 0.044715, %v1679_v61 }
0x11ef   : > { %v1681_v63 = vadd.f32 %v1680_v62, %v1673_v57 }
0x11f1   : > { %v1682_v0 = vmul.f32 0.7978846, %v1681_v63 }
0x11f3   : > { %2309 = vtanh.f32 %v1682_v0 }
0x1200   : > { %v2310_v1 = vpop.eup %2309 }
0x1201   : > { %v1684_v2 = vadd.f32 1.0, %v2310_v1 }
0x1203   : > { %v1685_v3 = vmul.f32 0.5, %v1684_v2 }
0x1205   : > { %v1686_v4 = vmul.f32 %v1685_v3, %v1673_v57 }
0x1207   : > { %v1687_v5 = vpack.c.bf16 %v1686_v4, %v1686_v4 }
0x1209   : > { %2203 = vmatmul.mubr.msk.bf16.vlgmr.msra.gmra.mxu0 %vm1136_vm5, %v1687_v5 }
0x12c9   : > { %v1766_v7 = vpop.f32.mrf.mxu0 }
0x12ca   : > { %v1767_v9 = vadd.f32 %v2023_v6, %v1766_v7 }
0x12cb   : > { %v2204_v10 = vpop.f32.mrf.mxu0 }
0x12cc   : > { %v1772_v11 = vadd.f32 %v1767_v9, %v1608_v49 }
0x12cd   : > { %v1769_v12 = vpop.f32.mrf.mxu0 }
0x12ce   : > { %v1777_v13 = vsel %vm588_vm0, %v1772_v11, 0.0 }
0x12cf   : > { %1778 = vadd.xlane.f32.xlu0 %v1777_v13  ;;  %v2205_v14 = vpop.f32.mrf.mxu0 }
0x1358   : > { %v1779_v15 = vpop.xlane.xlu0 %1778 }
0x1359   : > { %v1780_v16 = vmul.f32 0.03125, %v1779_v15 }
0x135b   : > { %v1781_v17 = vsub.f32 %v1772_v11, %v1780_v16 }
0x135d   : > { %v1782_v19 = vmul.f32 %v1781_v17, %v1781_v17 }
0x135f   : > { %v1783_v20 = vsel %vm588_vm0, %v1782_v19, 0.0 }
0x1360   : > { %1784 = vadd.xlane.f32.xlu1 %v1783_v20 }
0x13e9   : > { %v1785_v23 = vpop.xlane.xlu1 %1784 }
0x13ea   : > { %v1786_v24 = vmul.f32 0.03125, %v1785_v23 }
0x13ec   : > { %v1787_v25 = vadd.f32 1e-12, %v1786_v24 }
0x13ee   : > { %2311 = vrsqrt.f32 %v1787_v25 }
0x13fb   : > { %v2312_v27 = vpop.eup %2311 }
0x13fc   : > { %v1789_v29 = vmul.f32 %v2312_v27, %v1781_v17 }
0x13fe   : > { %v1796_v31 = vmul.f32 %v2031_v28, %v1789_v29 }
0x1400   : > { %v1803_v33 = vadd.f32 %v2032_v30, %v1796_v31 }
0x1402   : > { %v1804_v8 = vpack.c.bf16 %v1803_v33, %v1803_v33 }
0x1404   : > { %2211 = vmatmul.mubr.msk.bf16.vlgmr.msra.gmra.mxu1 %vm588_vm0, %v1804_v8 }
0x14c4   : > { %v1859_v18 = vpop.f32.mrf.mxu1 }
0x14c5   : > { %v1860_v35 = vadd.f32 %v1859_v18, %v1809_v34 }
0x14c6   : > { %v2212_v36 = vpop.f32.mrf.mxu1 }
0x14c7   : > { %2313 = vtanh.f32 %v1860_v35 }
0x14c8   : > { %v1862_v37 = vpop.f32.mrf.mxu1 }
0x14ca   : > { %v2213_v38 = vpop.f32.mrf.mxu1 }
0x14d4   : > { %v2314_v39 = vpop.eup %2313 }
0x14d5   : > { %1867 = vst.msk [vmem:[%s576_s22] sm:$0x1] %vm1866_vm6, %v2314_v39 }
0x14d6   : > { %2328 = shalt.err (!%p2325_p3)
}
0x14d7   : > { %s2329_s19 = scalar_lea.hbm %s2806_s3, 16  ;;  %s2333_s4 = scalar_lea.hbm %s2859_s18, 32 }
0x14d8   : > { %p2330_p4 = scmp.ne.s32.totalorder %s2806_s3, %s2329_s19  ;;  %p2334_p9 = scmp.lt.s32.totalorder %s2806_s3, %s2859_s18 }
0x14d9   : > { %p2335_p10 = scmp.lt.s32.totalorder %s2333_s4, %s2329_s19 }
0x14da   : > { %p2331_p7 = pnand %p2330_p4, %p2519_p5 }
0x14db   : > { %p2336_p11 = por %p2335_p10, %p2334_p9 }
0x14dc   : > { %p2332_p8 = pneg %p2331_p7 }
0x14de   : > { %p2337_p12 = pnand %p2336_p11, %p2332_p8 }
0x14e0   : > { %2340 = shalt.err (!%p2337_p12)
}
0x14e1   : > { %2214 = dma.vmem_to_hbm [thread:$0]  (%p2519_p5), %s1882_s20, 16, %s2806_s3, %s1869_s24  }
0x14e2 PF: > { %p2220_p13 = scmp.ge.s32.totalorder %s2375_s30, 2  ;;  %s1893_s5 = sand.u32 1, %s2363_s27  }
0x14e3   : > { %s1894_s21 = scalar_lea.sflag [#allocation3], %s1893_s5 }
0x14e4   : > { %p2217_p0 = pnand %p2220_p13, %p2523_p6 }
0x14e6   : > { %p2218_p1 = pneg %p2217_p0 }
0x14e8   : > { %2358 = dma.done.wait (%p2218_p1), %s1894_s21, 16  }
0x14e9   : > { %2360 = vsyncadd (%p2218_p1), %s1894_s21, 4294967280  ;;  %s2887_s0 = sld [smem:[#allocation5_spill]]  ;;  %p28_p2 = scmp.ge.s32.totalorder %s2506_s1, 4  }
0x14ea   : > { %s2888_s29 = sld [smem:[#allocation6_spill]]  ;;  %s2889_s27 = smov %s2367_s28 }
0x14eb   : > { %s2891_s30 = smov %s2506_s1  ;;  %30 = sbr.rel (!%p28_p2) target bundleno = 10 (0xa), region = 142 }
0x14ef   : > { %s2890_s28 = smov %s2887_s0 }
0x14f0   :  { %1898 = vsyncpa [#allocation3], 1 }
0x14f1   :  { %1900 = vsyncpa [#allocation3 + $0x1], 1 }

</bundles_post_ra>
